<compile_context>
chip_gen: v7x
topology: tpu7x:2x2x1
jax: 0.10.0
libtpu: 0.0.40
codegen_flags: <defaults>
</compile_context>

<pallas_src>
import numpy as np

import jax
import jax.numpy as jnp
from jax import lax
from jax.experimental import pallas as pl
from jax.experimental.pallas import tpu as pltpu


# ----------------------------------------------------------------------------
# Fused LeNet forward kernel (TB batch elements per grid step)
# ----------------------------------------------------------------------------
def _lenet_kernel(x_ref, w1b_ref, b1_ref, s1e_ref, s1o_ref,
                  w2b_ref, b2_ref, s2e_ref, s2o_ref,
                  fw1_ref, fb1_ref, fw2_ref, fb2_ref, fw3_ref, fb3_ref,
                  out_ref):
    f32 = jnp.float32
    tb = x_ref.shape[1]                                          # batch block (mult of 8)
    x = x_ref[...]                                               # (28, TB, 28), H leading

    # ---- conv1 + bias + ReLU: one (24*TB,140)x(140,144) width-banded matmul ----
    xc1 = jnp.concatenate([x[ki:ki + 24] for ki in range(5)], axis=-1)   # (24,TB,140)
    xc1 = xc1.reshape(24 * tb, 140)
    y1 = jnp.dot(xc1, w1b_ref[...], preferred_element_type=f32) + b1_ref[...]
    y1 = jnp.maximum(y1, 0.0)                                    # (24*TB,144) col=w*6+c

    # ---- maxpool1 2x2: H via leading-dim pair max, W via selector matmuls ------
    y1 = y1.reshape(12, 2, tb, 144)
    hp1 = jnp.maximum(y1[:, 0], y1[:, 1]).reshape(12 * tb, 144)
    p1 = jnp.maximum(jnp.dot(hp1, s1e_ref[...], preferred_element_type=f32),
                     jnp.dot(hp1, s1o_ref[...], preferred_element_type=f32))  # (12*TB,72)

    # ---- conv2 + bias + ReLU: one (8*TB,360)x(360,128) width-banded matmul -----
    p1 = p1.reshape(12, tb, 72)
    xc2 = jnp.concatenate([p1[ki:ki + 8] for ki in range(5)], axis=-1)   # (8,TB,360)
    xc2 = xc2.reshape(8 * tb, 360)
    y2 = jnp.dot(xc2, w2b_ref[...], preferred_element_type=f32) + b2_ref[...]
    y2 = jnp.maximum(y2, 0.0)                                    # (8*TB,128) col=w*16+c

    # ---- maxpool2 2x2 ------------------------------------------------------------
    y2 = y2.reshape(4, 2, tb, 128)
    hp2 = jnp.maximum(y2[:, 0], y2[:, 1]).reshape(4 * tb, 128)
    p2 = jnp.maximum(jnp.dot(hp2, s2e_ref[...], preferred_element_type=f32),
                     jnp.dot(hp2, s2o_ref[...], preferred_element_type=f32))  # (4*TB,64)

    # ---- flatten: order h*64+w*16+c (fc1 weight rows are pre-permuted to match) -
    p2 = p2.reshape(4, tb, 64)
    flat = jnp.concatenate([p2[0], p2[1], p2[2], p2[3]], axis=-1)         # (TB,256)

    # ---- fc1 + ReLU, fc2 + ReLU, fc3: whole-block GEMMs --------------------------
    h = jnp.maximum(jnp.dot(flat, fw1_ref[...], preferred_element_type=f32)
                    + fb1_ref[...], 0.0)                          # (TB,120)
    h = jnp.maximum(jnp.dot(h, fw2_ref[...], preferred_element_type=f32)
                    + fb2_ref[...], 0.0)                          # (TB,84)
    out = jnp.dot(h, fw3_ref[...], preferred_element_type=f32) + fb3_ref[...]
    out_ref[...] = out.astype(out_ref.dtype)                      # (TB, n_classes)


# ----------------------------------------------------------------------------
# Host-side parameter prep (done ONCE)
# ----------------------------------------------------------------------------
def prepare_params(params):
    """PyTorch-layout params -> kernel's banded / permuted matmul layouts."""
    w1 = np.asarray(params["w1"], np.float32)        # (6,1,5,5)
    b1 = np.asarray(params["b1"], np.float32)        # (6,)
    w2 = np.asarray(params["w2"], np.float32)        # (16,6,5,5)
    b2 = np.asarray(params["b2"], np.float32)        # (16,)
    fc1_w = np.asarray(params["fc1_w"], np.float32)  # (120,256)
    fc2_w = np.asarray(params["fc2_w"], np.float32)  # (84,120)
    fc3_w = np.asarray(params["fc3_w"], np.float32)  # (nc,84)
    nc = fc3_w.shape[0]

    # conv1 as a width-banded matmul: rows = ki*28 + w_in, cols = w_out*6 + c_out.
    w1b = np.zeros((5 * 28, 24 * 6), np.float32)
    for ki in range(5):
        for kj in range(5):
            for wo in range(24):
                w1b[ki * 28 + wo + kj, wo * 6:(wo + 1) * 6] = w1[:, 0, ki, kj]
    b1big = np.tile(b1, 24).reshape(1, 144)

    # conv2 as a width-banded matmul: rows = ki*72 + w_in*6 + c_in, cols = w_out*16 + c_out.
    w2b = np.zeros((5 * 72, 8 * 16), np.float32)
    for ki in range(5):
        for kj in range(5):
            for wo in range(8):
                for cin in range(6):
                    w2b[ki * 72 + (wo + kj) * 6 + cin,
                        wo * 16:(wo + 1) * 16] = w2[:, cin, ki, kj]
    b2big = np.tile(b2, 8).reshape(1, 128)

    # even/odd W-pool selector matrices (applied once per block).
    def selectors(n_w_in, n_c):
        n_w_out = n_w_in // 2
        se = np.zeros((n_w_in * n_c, n_w_out * n_c), np.float32)
        so = np.zeros_like(se)
        for wo in range(n_w_out):
            for c in range(n_c):
                se[(2 * wo) * n_c + c, wo * n_c + c] = 1.0
                so[(2 * wo + 1) * n_c + c, wo * n_c + c] = 1.0
        return se, so

    s1e, s1o = selectors(24, 6)    # (144, 72)
    s2e, s2o = selectors(8, 16)    # (128, 64)

    # fc1: kernel flatten index m = h*64 + w*16 + c  <->  PyTorch index c*16 + h*4 + w.
    fw1 = np.zeros((256, 120), np.float32)
    for h in range(4):
        for w in range(4):
            for c in range(16):
                fw1[h * 64 + w * 16 + c, :] = fc1_w[:, c * 16 + h * 4 + w]
    fb1 = np.asarray(params["fc1_b"], np.float32).reshape(1, 120)
    fw2 = fc2_w.T.copy()                              # (120, 84)
    fb2 = np.asarray(params["fc2_b"], np.float32).reshape(1, 84)
    fw3 = fc3_w.T.copy()                              # (84, nc)
    fb3 = np.asarray(params["fc3_b"], np.float32).reshape(1, nc)

    arrs = (w1b, b1big, s1e, s1o, w2b, b2big, s2e, s2o,
            fw1, fb1, fw2, fb2, fw3, fb3)
    return tuple(jnp.asarray(a) for a in arrs)


def _pick_tb(batch, tb_max=64):
    """Batch-block size: multiple of 8 (layout-preserving in-kernel reshapes),
    ~ceil(B/2) so there are >=2 grid steps when possible (v7x megacore), capped
    at 64 so per-step VMEM stays tiny on v7x's 64 MiB."""
    half = -(-batch // 2)            # ceil(B/2)
    tb = -(-half // 8) * 8           # round up to multiple of 8
    return max(8, min(tb_max, tb))


def lenet_forward(prepped, x, tb=None):
    """x: (B, 1, 28, 28) NCHW float32 -> logits (B, n_classes)."""
    (w1b, b1, s1e, s1o, w2b, b2, s2e, s2o,
     fw1, fb1, fw2, fb2, fw3, fb3) = prepped
    B = x.shape[0]
    assert x.shape[1:] == (1, 28, 28), "LeNet expects (B, 1, 28, 28) inputs"
    nc = fw3.shape[1]

    if tb is None:
        tb = _pick_tb(B)
    assert tb % 8 == 0
    bp = ((B + tb - 1) // tb) * tb

    xs = x.reshape(B, 28, 28)
    if bp != B:
        xs = jnp.pad(xs, ((0, bp - B), (0, 0), (0, 0)))
    xs = xs.transpose(1, 0, 2)                        # (28, Bp, 28): H leading

    out = pl.pallas_call(
        _lenet_kernel,
        grid=(bp // tb,),
        in_specs=[
            pl.BlockSpec((28, tb, 28), lambda i: (0, i, 0)),    # raw images (H, TB, W)
            pl.BlockSpec((140, 144), lambda i: (0, 0)),         # conv1 banded weights
            pl.BlockSpec((1, 144), lambda i: (0, 0)),           # conv1 bias (tiled)
            pl.BlockSpec((144, 72), lambda i: (0, 0)),          # pool1 even selector
            pl.BlockSpec((144, 72), lambda i: (0, 0)),          # pool1 odd selector
            pl.BlockSpec((360, 128), lambda i: (0, 0)),         # conv2 banded weights
            pl.BlockSpec((1, 128), lambda i: (0, 0)),           # conv2 bias (tiled)
            pl.BlockSpec((128, 64), lambda i: (0, 0)),          # pool2 even selector
            pl.BlockSpec((128, 64), lambda i: (0, 0)),          # pool2 odd selector
            pl.BlockSpec((256, 120), lambda i: (0, 0)),         # fc1 weights (permuted)
            pl.BlockSpec((1, 120), lambda i: (0, 0)),           # fc1 bias
            pl.BlockSpec((120, 84), lambda i: (0, 0)),          # fc2 weights
            pl.BlockSpec((1, 84), lambda i: (0, 0)),            # fc2 bias
            pl.BlockSpec((84, nc), lambda i: (0, 0)),           # fc3 weights
            pl.BlockSpec((1, nc), lambda i: (0, 0)),            # fc3 bias
        ],
        out_specs=pl.BlockSpec((tb, nc), lambda i: (i, 0)),
        out_shape=jax.ShapeDtypeStruct((bp, nc), jnp.float32),
        compiler_params=pltpu.CompilerParams(
            dimension_semantics=("parallel",),
            vmem_limit_bytes=32 * 1024 * 1024),
    )(xs, w1b, b1, s1e, s1o, w2b, b2, s2e, s2o,
      fw1, fb1, fw2, fb2, fw3, fb3)
    return out[:B]


# ----------------------------------------------------------------------------
# Parameter init (PyTorch default-style) and pure-JAX reference
# ----------------------------------------------------------------------------
def init_params(key, n_classes=10):
    ks = jax.random.split(key, 10)

    def u(k, shape, fan_in):
        bound = 1.0 / float(fan_in) ** 0.5
        return jax.random.uniform(k, shape, jnp.float32, -bound, bound)

    return dict(
        w1=u(ks[0], (6, 1, 5, 5), 25),       b1=u(ks[1], (6,), 25),
        w2=u(ks[2], (16, 6, 5, 5), 150),     b2=u(ks[3], (16,), 150),
        fc1_w=u(ks[4], (120, 256), 256),     fc1_b=u(ks[5], (120,), 256),
        fc2_w=u(ks[6], (84, 120), 120),      fc2_b=u(ks[7], (84,), 120),
        fc3_w=u(ks[8], (n_classes, 84), 84), fc3_b=u(ks[9], (n_classes,), 84),
    )


def reference_forward(params, x):
    """Pure-JAX reference (same math, original PyTorch layouts)."""
    def conv(x, w, b):
        y = lax.conv_general_dilated(
            x, w, (1, 1), "VALID", dimension_numbers=("NCHW", "OIHW", "NCHW"))
        return jax.nn.relu(y + b.reshape(1, -1, 1, 1))

    def pool(x):
        return lax.reduce_window(x, -jnp.inf, lax.max,
                                 (1, 1, 2, 2), (1, 1, 2, 2), "VALID")

    x = pool(conv(x, params["w1"], params["b1"]))
    x = pool(conv(x, params["w2"], params["b2"]))
    x = x.reshape(x.shape[0], -1)
    x = jax.nn.relu(x @ params["fc1_w"].T + params["fc1_b"])
    x = jax.nn.relu(x @ params["fc2_w"].T + params["fc2_b"])
    return x @ params["fc3_w"].T + params["fc3_b"]


if __name__ == "__main__":
    key = jax.random.PRNGKey(0)
    kx, kp = jax.random.split(key)
    # fc1 expects 256 = 16*4*4 features -> spatial input must be 1x28x28.
    x = jax.random.normal(kx, (2, 1, 28, 28), dtype=jnp.float32)
    params = init_params(kp, n_classes=10)
    prepped = prepare_params(params)          # one-time weight layout prep

    fwd = jax.jit(lenet_forward)
    out = jax.block_until_ready(fwd(prepped, x))
    assert out.shape == (2, 10)

    ref = jax.block_until_ready(reference_forward(params, x))
    max_err = float(jnp.max(jnp.abs(out - ref)))
    # Tolerance documents accepted default-precision MXU (possible bf16-pass) rounding.
    assert jnp.allclose(out, ref, atol=2e-2, rtol=2e-2), max_err

    print("KERNEL_OK")
</pallas_src>

<mosaic_0001>
module attributes {stable_mosaic.version = 11 : i64} {
  func.func @_lenet_kernel(%arg0: i32, %arg1: memref<28x8x28xf32, #tpu.memory_space<vmem>>, %arg2: memref<140x144xf32, #tpu.memory_space<vmem>>, %arg3: memref<1x144xf32, #tpu.memory_space<vmem>>, %arg4: memref<144x72xf32, #tpu.memory_space<vmem>>, %arg5: memref<144x72xf32, #tpu.memory_space<vmem>>, %arg6: memref<360x128xf32, #tpu.memory_space<vmem>>, %arg7: memref<1x128xf32, #tpu.memory_space<vmem>>, %arg8: memref<128x64xf32, #tpu.memory_space<vmem>>, %arg9: memref<128x64xf32, #tpu.memory_space<vmem>>, %arg10: memref<256x120xf32, #tpu.memory_space<vmem>>, %arg11: memref<1x120xf32, #tpu.memory_space<vmem>>, %arg12: memref<120x84xf32, #tpu.memory_space<vmem>>, %arg13: memref<1x84xf32, #tpu.memory_space<vmem>>, %arg14: memref<84x10xf32, #tpu.memory_space<vmem>>, %arg15: memref<1x10xf32, #tpu.memory_space<vmem>>, %arg16: memref<8x10xf32, #tpu.memory_space<vmem>>) attributes {dimension_semantics = [#tpu.dimension_semantics<parallel>], iteration_bounds = array<i64: 1>, scalar_prefetch = 0 : i64, scratch_operands = 0 : i64, tpu.core_type = #tpu.core_type<tc>, window_params = [{transform_indices = @transform_0, window_bounds = array<i64: 28, 8, 28>}, {pipeline_mode = #tpu.pipeline_mode<synchronous>, transform_indices = @transform_1, window_bounds = array<i64: 140, 144>}, {pipeline_mode = #tpu.pipeline_mode<synchronous>, transform_indices = @transform_2, window_bounds = array<i64: 1, 144>}, {pipeline_mode = #tpu.pipeline_mode<synchronous>, transform_indices = @transform_3, window_bounds = array<i64: 144, 72>}, {pipeline_mode = #tpu.pipeline_mode<synchronous>, transform_indices = @transform_4, window_bounds = array<i64: 144, 72>}, {pipeline_mode = #tpu.pipeline_mode<synchronous>, transform_indices = @transform_5, window_bounds = array<i64: 360, 128>}, {pipeline_mode = #tpu.pipeline_mode<synchronous>, transform_indices = @transform_6, window_bounds = array<i64: 1, 128>}, {pipeline_mode = #tpu.pipeline_mode<synchronous>, transform_indices = @transform_7, window_bounds = array<i64: 128, 64>}, {pipeline_mode = #tpu.pipeline_mode<synchronous>, transform_indices = @transform_8, window_bounds = array<i64: 128, 64>}, {pipeline_mode = #tpu.pipeline_mode<synchronous>, transform_indices = @transform_9, window_bounds = array<i64: 256, 120>}, {pipeline_mode = #tpu.pipeline_mode<synchronous>, transform_indices = @transform_10, window_bounds = array<i64: 1, 120>}, {pipeline_mode = #tpu.pipeline_mode<synchronous>, transform_indices = @transform_11, window_bounds = array<i64: 120, 84>}, {pipeline_mode = #tpu.pipeline_mode<synchronous>, transform_indices = @transform_12, window_bounds = array<i64: 1, 84>}, {pipeline_mode = #tpu.pipeline_mode<synchronous>, transform_indices = @transform_13, window_bounds = array<i64: 84, 10>}, {pipeline_mode = #tpu.pipeline_mode<synchronous>, transform_indices = @transform_14, window_bounds = array<i64: 1, 10>}, {transform_indices = @transform_15, window_bounds = array<i64: 8, 10>}]} {
    %c0 = arith.constant 0 : index
    %c0_0 = arith.constant 0 : index
    %c0_1 = arith.constant 0 : index
    %0 = vector.load %arg1[%c0, %c0_0, %c0_1] : memref<28x8x28xf32, #tpu.memory_space<vmem>>, vector<28x8x28xf32>
    %1 = vector.extract_strided_slice %0 {offsets = [0, 0, 0], sizes = [24, 8, 28], strides = [1, 1, 1]} : vector<28x8x28xf32> to vector<24x8x28xf32>
    %2 = vector.extract_strided_slice %0 {offsets = [1, 0, 0], sizes = [24, 8, 28], strides = [1, 1, 1]} : vector<28x8x28xf32> to vector<24x8x28xf32>
    %3 = vector.extract_strided_slice %0 {offsets = [2, 0, 0], sizes = [24, 8, 28], strides = [1, 1, 1]} : vector<28x8x28xf32> to vector<24x8x28xf32>
    %4 = vector.extract_strided_slice %0 {offsets = [3, 0, 0], sizes = [24, 8, 28], strides = [1, 1, 1]} : vector<28x8x28xf32> to vector<24x8x28xf32>
    %5 = vector.extract_strided_slice %0 {offsets = [4, 0, 0], sizes = [24, 8, 28], strides = [1, 1, 1]} : vector<28x8x28xf32> to vector<24x8x28xf32>
    %6 = tpu.concatenate %1, %2, %3, %4, %5 in 2 : vector<24x8x28xf32>, vector<24x8x28xf32>, vector<24x8x28xf32>, vector<24x8x28xf32>, vector<24x8x28xf32> -> vector<24x8x140xf32>
    %7 = vector.shape_cast %6 : vector<24x8x140xf32> to vector<192x140xf32>
    %c0_2 = arith.constant 0 : index
    %c0_3 = arith.constant 0 : index
    %8 = vector.load %arg2[%c0_2, %c0_3] : memref<140x144xf32, #tpu.memory_space<vmem>>, vector<140x144xf32>
    %cst = arith.constant dense<0.000000e+00> : vector<192x144xf32>
    %9 = tpu.matmul %7, %8, %cst {dimension_numbers = #tpu.dot_dimension_numbers<[1], [0], [0], [1], [0, 0, 1, 1], [], []>} : vector<192x140xf32>, vector<140x144xf32>, vector<192x144xf32> -> vector<192x144xf32>
    %c0_4 = arith.constant 0 : index
    %c0_5 = arith.constant 0 : index
    %10 = vector.load %arg3[%c0_4, %c0_5] : memref<1x144xf32, #tpu.memory_space<vmem>>, vector<1x144xf32>
    %11 = vector.broadcast %10 : vector<1x144xf32> to vector<192x144xf32>
    %12 = arith.addf %9, %11 : vector<192x144xf32>
    %cst_6 = arith.constant 0.000000e+00 : f32
    %13 = vector.broadcast %cst_6 : f32 to vector<192x144xf32>
    %14 = arith.maximumf %12, %13 : vector<192x144xf32>
    %15 = vector.shape_cast %14 : vector<192x144xf32> to vector<12x2x8x144xf32>
    %16 = vector.extract_strided_slice %15 {offsets = [0, 0, 0, 0], sizes = [12, 1, 8, 144], strides = [1, 1, 1, 1]} : vector<12x2x8x144xf32> to vector<12x1x8x144xf32>
    %17 = vector.shape_cast %16 : vector<12x1x8x144xf32> to vector<12x8x144xf32>
    %18 = vector.extract_strided_slice %15 {offsets = [0, 1, 0, 0], sizes = [12, 1, 8, 144], strides = [1, 1, 1, 1]} : vector<12x2x8x144xf32> to vector<12x1x8x144xf32>
    %19 = vector.shape_cast %18 : vector<12x1x8x144xf32> to vector<12x8x144xf32>
    %20 = arith.maximumf %17, %19 : vector<12x8x144xf32>
    %21 = vector.shape_cast %20 : vector<12x8x144xf32> to vector<96x144xf32>
    %c0_7 = arith.constant 0 : index
    %c0_8 = arith.constant 0 : index
    %22 = vector.load %arg4[%c0_7, %c0_8] : memref<144x72xf32, #tpu.memory_space<vmem>>, vector<144x72xf32>
    %cst_9 = arith.constant dense<0.000000e+00> : vector<96x72xf32>
    %23 = tpu.matmul %21, %22, %cst_9 {dimension_numbers = #tpu.dot_dimension_numbers<[1], [0], [0], [1], [0, 0, 1, 1], [], []>} : vector<96x144xf32>, vector<144x72xf32>, vector<96x72xf32> -> vector<96x72xf32>
    %c0_10 = arith.constant 0 : index
    %c0_11 = arith.constant 0 : index
    %24 = vector.load %arg5[%c0_10, %c0_11] : memref<144x72xf32, #tpu.memory_space<vmem>>, vector<144x72xf32>
    %cst_12 = arith.constant dense<0.000000e+00> : vector<96x72xf32>
    %25 = tpu.matmul %21, %24, %cst_12 {dimension_numbers = #tpu.dot_dimension_numbers<[1], [0], [0], [1], [0, 0, 1, 1], [], []>} : vector<96x144xf32>, vector<144x72xf32>, vector<96x72xf32> -> vector<96x72xf32>
    %26 = arith.maximumf %23, %25 : vector<96x72xf32>
    %27 = vector.shape_cast %26 : vector<96x72xf32> to vector<12x8x72xf32>
    %28 = vector.extract_strided_slice %27 {offsets = [0, 0, 0], sizes = [8, 8, 72], strides = [1, 1, 1]} : vector<12x8x72xf32> to vector<8x8x72xf32>
    %29 = vector.extract_strided_slice %27 {offsets = [1, 0, 0], sizes = [8, 8, 72], strides = [1, 1, 1]} : vector<12x8x72xf32> to vector<8x8x72xf32>
    %30 = vector.extract_strided_slice %27 {offsets = [2, 0, 0], sizes = [8, 8, 72], strides = [1, 1, 1]} : vector<12x8x72xf32> to vector<8x8x72xf32>
    %31 = vector.extract_strided_slice %27 {offsets = [3, 0, 0], sizes = [8, 8, 72], strides = [1, 1, 1]} : vector<12x8x72xf32> to vector<8x8x72xf32>
    %32 = vector.extract_strided_slice %27 {offsets = [4, 0, 0], sizes = [8, 8, 72], strides = [1, 1, 1]} : vector<12x8x72xf32> to vector<8x8x72xf32>
    %33 = tpu.concatenate %28, %29, %30, %31, %32 in 2 : vector<8x8x72xf32>, vector<8x8x72xf32>, vector<8x8x72xf32>, vector<8x8x72xf32>, vector<8x8x72xf32> -> vector<8x8x360xf32>
    %34 = vector.shape_cast %33 : vector<8x8x360xf32> to vector<64x360xf32>
    %c0_13 = arith.constant 0 : index
    %c0_14 = arith.constant 0 : index
    %35 = vector.load %arg6[%c0_13, %c0_14] : memref<360x128xf32, #tpu.memory_space<vmem>>, vector<360x128xf32>
    %cst_15 = arith.constant dense<0.000000e+00> : vector<64x128xf32>
    %36 = tpu.matmul %34, %35, %cst_15 {dimension_numbers = #tpu.dot_dimension_numbers<[1], [0], [0], [1], [0, 0, 1, 1], [], []>} : vector<64x360xf32>, vector<360x128xf32>, vector<64x128xf32> -> vector<64x128xf32>
    %c0_16 = arith.constant 0 : index
    %c0_17 = arith.constant 0 : index
    %37 = vector.load %arg7[%c0_16, %c0_17] : memref<1x128xf32, #tpu.memory_space<vmem>>, vector<1x128xf32>
    %38 = vector.broadcast %37 : vector<1x128xf32> to vector<64x128xf32>
    %39 = arith.addf %36, %38 : vector<64x128xf32>
    %cst_18 = arith.constant 0.000000e+00 : f32
    %40 = vector.broadcast %cst_18 : f32 to vector<64x128xf32>
    %41 = arith.maximumf %39, %40 : vector<64x128xf32>
    %42 = vector.shape_cast %41 : vector<64x128xf32> to vector<4x2x8x128xf32>
    %43 = vector.extract_strided_slice %42 {offsets = [0, 0, 0, 0], sizes = [4, 1, 8, 128], strides = [1, 1, 1, 1]} : vector<4x2x8x128xf32> to vector<4x1x8x128xf32>
    %44 = vector.shape_cast %43 : vector<4x1x8x128xf32> to vector<4x8x128xf32>
    %45 = vector.extract_strided_slice %42 {offsets = [0, 1, 0, 0], sizes = [4, 1, 8, 128], strides = [1, 1, 1, 1]} : vector<4x2x8x128xf32> to vector<4x1x8x128xf32>
    %46 = vector.shape_cast %45 : vector<4x1x8x128xf32> to vector<4x8x128xf32>
    %47 = arith.maximumf %44, %46 : vector<4x8x128xf32>
    %48 = vector.shape_cast %47 : vector<4x8x128xf32> to vector<32x128xf32>
    %c0_19 = arith.constant 0 : index
    %c0_20 = arith.constant 0 : index
    %49 = vector.load %arg8[%c0_19, %c0_20] : memref<128x64xf32, #tpu.memory_space<vmem>>, vector<128x64xf32>
    %cst_21 = arith.constant dense<0.000000e+00> : vector<32x64xf32>
    %50 = tpu.matmul %48, %49, %cst_21 {dimension_numbers = #tpu.dot_dimension_numbers<[1], [0], [0], [1], [0, 0, 1, 1], [], []>} : vector<32x128xf32>, vector<128x64xf32>, vector<32x64xf32> -> vector<32x64xf32>
    %c0_22 = arith.constant 0 : index
    %c0_23 = arith.constant 0 : index
    %51 = vector.load %arg9[%c0_22, %c0_23] : memref<128x64xf32, #tpu.memory_space<vmem>>, vector<128x64xf32>
    %cst_24 = arith.constant dense<0.000000e+00> : vector<32x64xf32>
    %52 = tpu.matmul %48, %51, %cst_24 {dimension_numbers = #tpu.dot_dimension_numbers<[1], [0], [0], [1], [0, 0, 1, 1], [], []>} : vector<32x128xf32>, vector<128x64xf32>, vector<32x64xf32> -> vector<32x64xf32>
    %53 = arith.maximumf %50, %52 : vector<32x64xf32>
    %54 = vector.shape_cast %53 : vector<32x64xf32> to vector<4x8x64xf32>
    %55 = vector.extract_strided_slice %54 {offsets = [0, 0, 0], sizes = [1, 8, 64], strides = [1, 1, 1]} : vector<4x8x64xf32> to vector<1x8x64xf32>
    %56 = vector.shape_cast %55 : vector<1x8x64xf32> to vector<8x64xf32>
    %57 = vector.extract_strided_slice %54 {offsets = [1, 0, 0], sizes = [1, 8, 64], strides = [1, 1, 1]} : vector<4x8x64xf32> to vector<1x8x64xf32>
    %58 = vector.shape_cast %57 : vector<1x8x64xf32> to vector<8x64xf32>
    %59 = vector.extract_strided_slice %54 {offsets = [2, 0, 0], sizes = [1, 8, 64], strides = [1, 1, 1]} : vector<4x8x64xf32> to vector<1x8x64xf32>
    %60 = vector.shape_cast %59 : vector<1x8x64xf32> to vector<8x64xf32>
    %61 = vector.extract_strided_slice %54 {offsets = [3, 0, 0], sizes = [1, 8, 64], strides = [1, 1, 1]} : vector<4x8x64xf32> to vector<1x8x64xf32>
    %62 = vector.shape_cast %61 : vector<1x8x64xf32> to vector<8x64xf32>
    %63 = tpu.concatenate %56, %58, %60, %62 in 1 : vector<8x64xf32>, vector<8x64xf32>, vector<8x64xf32>, vector<8x64xf32> -> vector<8x256xf32>
    %c0_25 = arith.constant 0 : index
    %c0_26 = arith.constant 0 : index
    %64 = vector.load %arg10[%c0_25, %c0_26] : memref<256x120xf32, #tpu.memory_space<vmem>>, vector<256x120xf32>
    %cst_27 = arith.constant dense<0.000000e+00> : vector<8x120xf32>
    %65 = tpu.matmul %63, %64, %cst_27 {dimension_numbers = #tpu.dot_dimension_numbers<[1], [0], [0], [1], [0, 0, 1, 1], [], []>} : vector<8x256xf32>, vector<256x120xf32>, vector<8x120xf32> -> vector<8x120xf32>
    %c0_28 = arith.constant 0 : index
    %c0_29 = arith.constant 0 : index
    %66 = vector.load %arg11[%c0_28, %c0_29] : memref<1x120xf32, #tpu.memory_space<vmem>>, vector<1x120xf32>
    %67 = vector.broadcast %66 : vector<1x120xf32> to vector<8x120xf32>
    %68 = arith.addf %65, %67 : vector<8x120xf32>
    %cst_30 = arith.constant 0.000000e+00 : f32
    %69 = vector.broadcast %cst_30 : f32 to vector<8x120xf32>
    %70 = arith.maximumf %68, %69 : vector<8x120xf32>
    %c0_31 = arith.constant 0 : index
    %c0_32 = arith.constant 0 : index
    %71 = vector.load %arg12[%c0_31, %c0_32] : memref<120x84xf32, #tpu.memory_space<vmem>>, vector<120x84xf32>
    %cst_33 = arith.constant dense<0.000000e+00> : vector<8x84xf32>
    %72 = tpu.matmul %70, %71, %cst_33 {dimension_numbers = #tpu.dot_dimension_numbers<[1], [0], [0], [1], [0, 0, 1, 1], [], []>} : vector<8x120xf32>, vector<120x84xf32>, vector<8x84xf32> -> vector<8x84xf32>
    %c0_34 = arith.constant 0 : index
    %c0_35 = arith.constant 0 : index
    %73 = vector.load %arg13[%c0_34, %c0_35] : memref<1x84xf32, #tpu.memory_space<vmem>>, vector<1x84xf32>
    %74 = vector.broadcast %73 : vector<1x84xf32> to vector<8x84xf32>
    %75 = arith.addf %72, %74 : vector<8x84xf32>
    %cst_36 = arith.constant 0.000000e+00 : f32
    %76 = vector.broadcast %cst_36 : f32 to vector<8x84xf32>
    %77 = arith.maximumf %75, %76 : vector<8x84xf32>
    %c0_37 = arith.constant 0 : index
    %c0_38 = arith.constant 0 : index
    %78 = vector.load %arg14[%c0_37, %c0_38] : memref<84x10xf32, #tpu.memory_space<vmem>>, vector<84x10xf32>
    %cst_39 = arith.constant dense<0.000000e+00> : vector<8x10xf32>
    %79 = tpu.matmul %77, %78, %cst_39 {dimension_numbers = #tpu.dot_dimension_numbers<[1], [0], [0], [1], [0, 0, 1, 1], [], []>} : vector<8x84xf32>, vector<84x10xf32>, vector<8x10xf32> -> vector<8x10xf32>
    %c0_40 = arith.constant 0 : index
    %c0_41 = arith.constant 0 : index
    %80 = vector.load %arg15[%c0_40, %c0_41] : memref<1x10xf32, #tpu.memory_space<vmem>>, vector<1x10xf32>
    %81 = vector.broadcast %80 : vector<1x10xf32> to vector<8x10xf32>
    %82 = arith.addf %79, %81 : vector<8x10xf32>
    %c0_42 = arith.constant 0 : index
    %c0_43 = arith.constant 0 : index
    %83 = vector.load %arg16[%c0_42, %c0_43] : memref<8x10xf32, #tpu.memory_space<vmem>>, vector<8x10xf32>
    tpu.vector_store %arg16[%c0_42, %c0_43], %82 {strides = array<i32>} : memref<8x10xf32, #tpu.memory_space<vmem>>, vector<8x10xf32>,
    return
  }
  func.func @transform_0(%arg0: i32) -> (i32, i32, i32) {
    %c0_i32 = arith.constant 0 : i32
    %c0_i32_0 = arith.constant 0 : i32
    %c0_i32_1 = arith.constant 0 : i32
    return %c0_i32, %arg0, %c0_i32_0 : i32, i32, i32
  }
  func.func @transform_1(%arg0: i32) -> (i32, i32) {
    %c0_i32 = arith.constant 0 : i32
    %c0_i32_0 = arith.constant 0 : i32
    %c0_i32_1 = arith.constant 0 : i32
    return %c0_i32, %c0_i32_0 : i32, i32
  }
  func.func @transform_2(%arg0: i32) -> (i32, i32) {
    %c0_i32 = arith.constant 0 : i32
    %c0_i32_0 = arith.constant 0 : i32
    %c0_i32_1 = arith.constant 0 : i32
    return %c0_i32, %c0_i32_0 : i32, i32
  }
  func.func @transform_3(%arg0: i32) -> (i32, i32) {
    %c0_i32 = arith.constant 0 : i32
    %c0_i32_0 = arith.constant 0 : i32
    %c0_i32_1 = arith.constant 0 : i32
    return %c0_i32, %c0_i32_0 : i32, i32
  }
  func.func @transform_4(%arg0: i32) -> (i32, i32) {
    %c0_i32 = arith.constant 0 : i32
    %c0_i32_0 = arith.constant 0 : i32
    %c0_i32_1 = arith.constant 0 : i32
    return %c0_i32, %c0_i32_0 : i32, i32
  }
  func.func @transform_5(%arg0: i32) -> (i32, i32) {
    %c0_i32 = arith.constant 0 : i32
    %c0_i32_0 = arith.constant 0 : i32
    %c0_i32_1 = arith.constant 0 : i32
    return %c0_i32, %c0_i32_0 : i32, i32
  }
  func.func @transform_6(%arg0: i32) -> (i32, i32) {
    %c0_i32 = arith.constant 0 : i32
    %c0_i32_0 = arith.constant 0 : i32
    %c0_i32_1 = arith.constant 0 : i32
    return %c0_i32, %c0_i32_0 : i32, i32
  }
  func.func @transform_7(%arg0: i32) -> (i32, i32) {
    %c0_i32 = arith.constant 0 : i32
    %c0_i32_0 = arith.constant 0 : i32
    %c0_i32_1 = arith.constant 0 : i32
    return %c0_i32, %c0_i32_0 : i32, i32
  }
  func.func @transform_8(%arg0: i32) -> (i32, i32) {
    %c0_i32 = arith.constant 0 : i32
    %c0_i32_0 = arith.constant 0 : i32
    %c0_i32_1 = arith.constant 0 : i32
    return %c0_i32, %c0_i32_0 : i32, i32
  }
  func.func @transform_9(%arg0: i32) -> (i32, i32) {
    %c0_i32 = arith.constant 0 : i32
    %c0_i32_0 = arith.constant 0 : i32
    %c0_i32_1 = arith.constant 0 : i32
    return %c0_i32, %c0_i32_0 : i32, i32
  }
  func.func @transform_10(%arg0: i32) -> (i32, i32) {
    %c0_i32 = arith.constant 0 : i32
    %c0_i32_0 = arith.constant 0 : i32
    %c0_i32_1 = arith.constant 0 : i32
    return %c0_i32, %c0_i32_0 : i32, i32
  }
  func.func @transform_11(%arg0: i32) -> (i32, i32) {
    %c0_i32 = arith.constant 0 : i32
    %c0_i32_0 = arith.constant 0 : i32
    %c0_i32_1 = arith.constant 0 : i32
    return %c0_i32, %c0_i32_0 : i32, i32
  }
  func.func @transform_12(%arg0: i32) -> (i32, i32) {
    %c0_i32 = arith.constant 0 : i32
    %c0_i32_0 = arith.constant 0 : i32
    %c0_i32_1 = arith.constant 0 : i32
    return %c0_i32, %c0_i32_0 : i32, i32
  }
  func.func @transform_13(%arg0: i32) -> (i32, i32) {
    %c0_i32 = arith.constant 0 : i32
    %c0_i32_0 = arith.constant 0 : i32
    %c0_i32_1 = arith.constant 0 : i32
    return %c0_i32, %c0_i32_0 : i32, i32
  }
  func.func @transform_14(%arg0: i32) -> (i32, i32) {
    %c0_i32 = arith.constant 0 : i32
    %c0_i32_0 = arith.constant 0 : i32
    %c0_i32_1 = arith.constant 0 : i32
    return %c0_i32, %c0_i32_0 : i32, i32
  }
  func.func @transform_15(%arg0: i32) -> (i32, i32) {
    %c0_i32 = arith.constant 0 : i32
    %c0_i32_0 = arith.constant 0 : i32
    return %arg0, %c0_i32 : i32, i32
  }
}

</mosaic_0001>

<bundles_post_ra>
// kernel: lenet_forward.1
= control target key start
LH: loop header
LB: loop body
LE: loop exit
PB: predicated region body
PF: predicated region fallthrough
CT: control target
= control target key end

     0   :  { %s3103_s26 = smov 84   ;;  %s3104_s27 = smov 28   ;;  %vm590_vm0 = vcmask 1043456   ;;  %vm3107_vm1 = vmmov 1   ;;  %vm541_vm3 = vcmask 97280   ;;  %vm393_vm4 = vcmask 228352   ;;  %s4567_s0 = inlined_call_operand.vmem [shape: f32[28,8,28], index: 0, kind: input, shape index: {}]   ;;  %s4568_s1 = inlined_call_operand.vmem [shape: f32[140,144], index: 1, kind: input, shape index: {}]   ;;  %s4569_s3 = inlined_call_operand.vmem [shape: f32[144,72], index: 3, kind: input, shape index: {}]   ;;  %s4570_s2 = inlined_call_operand.vmem [shape: f32[1,144], index: 2, kind: input, shape index: {}]   ;;  %s4571_s4 = inlined_call_operand.vmem [shape: f32[144,72], index: 4, kind: input, shape index: {}]   ;;  %s4572_s5 = inlined_call_operand.vmem [shape: f32[360,128], index: 5, kind: input, shape index: {}]   ;;  %s4573_s7 = inlined_call_operand.vmem [shape: f32[128,64], index: 7, kind: input, shape index: {}]   ;;  %s4574_s8 = inlined_call_operand.vmem [shape: f32[128,64], index: 8, kind: input, shape index: {}]   ;;  %s4575_s6 = inlined_call_operand.vmem [shape: f32[1,128], index: 6, kind: input, shape index: {}]   ;;  %s4576_s9 = inlined_call_operand.vmem [shape: f32[256,120], index: 9, kind: input, shape index: {}]   ;;  %s4577_s11 = inlined_call_operand.vmem [shape: f32[120,84], index: 11, kind: input, shape index: {}]   ;;  %s4578_s10 = inlined_call_operand.vmem [shape: f32[1,120], index: 10, kind: input, shape index: {}]   ;;  %s4579_s13 = inlined_call_operand.vmem [shape: f32[84,10], index: 13, kind: input, shape index: {}]   ;;  %s4580_s12 = inlined_call_operand.vmem [shape: f32[1,84], index: 12, kind: input, shape index: {}]   ;;  %s4581_s14 = inlined_call_operand.vmem [shape: f32[1,10], index: 14, kind: input, shape index: {}]   ;;  %s4582_s15 = inlined_call_operand.vmem [shape: f32[8,10], index: 15, kind: output, shape index: {}]  }
   0x1   :  { %v3199_v0 = vld [vmem:[%s4567_s0 + $0x18] sm:$0xff]  ;;  %v3204_v1 = vld [vmem:[%s4567_s0 + $0x20] sm:$0xff]  ;;  %v3209_v2 = vld [vmem:[%s4567_s0 + $0x8] sm:$0xff]  ;;  %s3105_s30 = smov 112   ;;  %s3106_s22 = smov 56   ;;  %vm418_vm5 = vcmask 457728  }
   0x2   :  { %v2898_v3 = vpack.i.bf16 %v3204_v1, %v3199_v0  ;;  %v3216_v4 = vld [vmem:[%s4567_s0 + $0x10] sm:$0xff]  ;;  %v494_v7 = vld [vmem:[%s4568_s1 + $0x8] sm:$0xff]  ;;  %v496_v9 = vld [vmem:[%s4568_s1 + $0x18] sm:$0xff]  ;;  %vm443_vm6 = vcmask 687104   ;;  %vm468_vm7 = vcmask 916480   ;;  %vm896_vm8 = vcmask 130048  }
   0x3   :  { %v2888_v5 = vpack.i.bf16 %v3216_v4, %v3209_v2  ;;  %v2893_v6 = vpack.i.bf16 %v3199_v0, %v3216_v4  ;;  %v3232_v8 = vld [vmem:[%s4567_s0 + $0x30] sm:$0xff]  ;;  %v493_v10 = vld [vmem:[%s4568_s1] sm:$0xff]  ;;  %v2595_v11 = vpack.c.bf16 %v496_v9, %v494_v7  ;;  %v498_v13 = vld [vmem:[%s4568_s1 + $0x28] sm:$0xff]  ;;  %s3109_s29 = smov 72   ;;  %s3110_s18 = smov 88   ;;  %vm1337_vm9 = vcmask 719872  }
   0x4   :  { %2899 = vrot.lane.b32.xlu1 %v2898_v3, %s3103_s26  ;;  %v495_v12 = vld [vmem:[%s4568_s1 + $0x10] sm:$0xff]  ;;  %v500_v14 = vld [vmem:[%s4568_s1 + $0x38] sm:$0xff]  ;;  %v3253_v15 = vld [vmem:[%s4567_s0 + $0x28] sm:$0xff]  ;;  %s3111_s19 = smov 16   ;;  %vm1320_vm10 = vcmask 588800   ;;  %vm1346_vm11 = vcmask 261120  }
   0x5   :  { %2889 = vrot.lane.b32.xlu0 %v2888_v5, %s3104_s27  ;;  %v2597_v16 = vpack.c.bf16 %v495_v12, %v493_v10  ;;  %v2599_v17 = vpack.c.bf16 %v500_v14, %v498_v13  ;;  %v497_v18 = vld [vmem:[%s4568_s1 + $0x20] sm:$0xff]  ;;  %v499_v19 = vld [vmem:[%s4568_s1 + $0x30] sm:$0xff]  ;;  %2596 = vmatprep.subr.bf16.mxu0 %v2595_v11  ;;  %v502_v20 = vld [vmem:[%s4568_s1 + $0x48] sm:$0xff]  ;;  %v2913_v22 = vpack.i.bf16 %v3232_v8, %v3253_v15  ;;  %vm1407_vm12 = vcmask 850944   ;;  %s3113_s21 = smov 64  }
   0x6   :  { %v504_v21 = vld [vmem:[%s4568_s1 + $0x58] sm:$0xff]  ;;  %v2601_v23 = vpack.c.bf16 %v499_v19, %v497_v18  ;;  %v2908_v24 = vpack.i.bf16 %v3253_v15, %v3204_v1  ;;  %v501_v26 = vld [vmem:[%s4568_s1 + $0x40] sm:$0xff]  ;;  %v503_v27 = vld [vmem:[%s4568_s1 + $0x50] sm:$0xff]  ;;  %vm1868_vm13 = vcmask 523264   ;;  %vm3115_vm14 = vmmov 0  }
   0x7   :  { %2598 = vmatpush1.bf16.msra.mxu0 %v2597_v16  ;;  %v2603_v25 = vpack.c.bf16 %v504_v21, %v502_v20  ;;  %v506_v28 = vld [vmem:[%s4568_s1 + $0x68] sm:$0xff]  ;;  %v508_v29 = vld [vmem:[%s4568_s1 + $0x78] sm:$0xff]  ;;  %v2605_v30 = vpack.c.bf16 %v503_v27, %v501_v26  ;;  %v505_v33 = vld [vmem:[%s4568_s1 + $0x60] sm:$0xff]  ;;  %vm2003_vm15 = vcmask 982016  }
   0x8   :  { %321 = vrot.lane.b32.xlu1 %v3204_v1, %s3105_s30  ;;  %2600 = vmatprep.subr.bf16.mxu0 %v2599_v17  ;;  %v3291_v31 = vld [vmem:[%s4567_s0 + $0x38] sm:$0xff]  ;;  %v2607_v32 = vpack.c.bf16 %v508_v29, %v506_v28  ;;  %v507_v34 = vld [vmem:[%s4568_s1 + $0x70] sm:$0xff]  ;;  %v510_v35 = vld [vmem:[%s4568_s1 + $0x88] sm:$0xff] }
   0x9   :  { %2894 = vrot.lane.b32.xlu0 %v2893_v6, %s3106_s22  ;;  %v512_v36 = vld [vmem:[%s4568_s1 + $0x98] sm:$0xff]  ;;  %v2923_v37 = vpack.i.bf16 %v3291_v31, %v3232_v8  ;;  %v2609_v38 = vpack.c.bf16 %v507_v34, %v505_v33  ;;  %v509_v40 = vld [vmem:[%s4568_s1 + $0x80] sm:$0xff]  ;;  %v511_v41 = vld [vmem:[%s4568_s1 + $0x90] sm:$0xff] }
   0xa   :  { %v2611_v39 = vpack.c.bf16 %v512_v36, %v510_v35  ;;  %v3320_v42 = vld [vmem:[%s4567_s0 + $0x40] sm:$0xff]  ;;  %v514_v43 = vld [vmem:[%s4568_s1 + $0xa8] sm:$0xff]  ;;  %v516_v44 = vld [vmem:[%s4568_s1 + $0xb8] sm:$0xff]  ;;  %v2613_v45 = vpack.c.bf16 %v511_v41, %v509_v40 }
   0xb   :  { %2602 = vmatpush1.bf16.msra.mxu0 %v2601_v23  ;;  %v2928_v46 = vpack.i.bf16 %v3320_v42, %v3291_v31  ;;  %v2615_v47 = vpack.c.bf16 %v516_v44, %v514_v43  ;;  %v513_v48 = vld [vmem:[%s4568_s1 + $0xa0] sm:$0xff]  ;;  %v515_v49 = vld [vmem:[%s4568_s1 + $0xb0] sm:$0xff]  ;;  %v518_v50 = vld [vmem:[%s4568_s1 + $0xc8] sm:$0xff] }
   0xc   :  { %2904 = vrot.lane.b32.xlu1 %v2898_v3, %s3104_s27  ;;  %2604 = vmatprep.subr.bf16.mxu0 %v2603_v25  ;;  %v520_v51 = vld [vmem:[%s4568_s1 + $0xd8] sm:$0xff]  ;;  %v2617_v52 = vpack.c.bf16 %v515_v49, %v513_v48  ;;  %v3350_v53 = vld [vmem:[%s4567_s0 + $0x50] sm:$0xff]  ;;  %v517_v55 = vld [vmem:[%s4568_s1 + $0xc0] sm:$0xff] }
   0xd   :  { %323 = vrot.lane.b32.xlu0 %v3253_v15, %s3105_s30  ;;  %v2619_v54 = vpack.c.bf16 %v520_v51, %v518_v50  ;;  %v519_v56 = vld [vmem:[%s4568_s1 + $0xd0] sm:$0xff]  ;;  %v3361_v57 = vld [vmem:[%s4567_s0 + $0x48] sm:$0xff]  ;;  %v524_v59 = vld [vmem:[%s4568_s1 + $0xf8] sm:$0xff] }
   0xe   :  { %v522_v58 = vld [vmem:[%s4568_s1 + $0xe8] sm:$0xff]  ;;  %v2943_v60 = vpack.i.bf16 %v3350_v53, %v3361_v57  ;;  %v2621_v61 = vpack.c.bf16 %v519_v56, %v517_v55  ;;  %v2938_v62 = vpack.i.bf16 %v3361_v57, %v3320_v42  ;;  %v521_v3 = vld [vmem:[%s4568_s1 + $0xe0] sm:$0xff]  ;;  %v523_v5 = vld [vmem:[%s4568_s1 + $0xf0] sm:$0xff] }
   0xf   :  { %2606 = vmatpush1.bf16.msra.mxu0 %v2605_v30  ;;  %v2623_v63 = vpack.c.bf16 %v524_v59, %v522_v58  ;;  %v526_v6 = vld [vmem:[%s4568_s1 + $0x108] sm:$0xff]  ;;  %v528_v7 = vld [vmem:[%s4568_s1 + $0x118] sm:$0xf]  ;;  %v2625_v9 = vpack.c.bf16 %v523_v5, %v521_v3  ;;  %v525_v12 = vld [vmem:[%s4568_s1 + $0x100] sm:$0xff] }
  0x10   :  { %2914 = vrot.lane.b32.xlu1 %v2913_v22, %s3103_s26  ;;  %2608 = vmatprep.subr.bf16.mxu0 %v2607_v32  ;;  %v3393_v10 = vld [vmem:[%s4567_s0 + $0x58] sm:$0xff]  ;;  %v2627_v11 = vpack.c.bf16 %v528_v7, %v526_v6  ;;  %v527_v13 = vld [vmem:[%s4568_s1 + $0x110] sm:$0xf]  ;;  %vm2628_vm2 = vmpackc.low %vm590_vm0, %vm3107_vm1  ;;  %vm2172_vm1 = vcmask 80896  }
  0x11   :  { %2909 = vrot.lane.b32.xlu0 %v2908_v24, %s3106_s22  ;;  %v2953_v14 = vpack.i.bf16 %v3393_v10, %v3350_v53  ;;  %v2630_v16 = vpack.c.bf16 %v527_v13, %v525_v12  ;;  %v3411_v17 = vld [vmem:[%s4567_s0 + $0x60] sm:$0xff]  ;;  %v3423_v19 = vld [vmem:[%s4567_s0 + $0x70] sm:$0xff]  ;;  %v3428_v20 = vld [vmem:[%s4567_s0 + $0x68] sm:$0xff] }
  0x12   :  { %v2958_v18 = vpack.i.bf16 %v3411_v17, %v3393_v10  ;;  %v2973_v21 = vpack.i.bf16 %v3423_v19, %v3428_v20  ;;  %v3442_v23 = vld [vmem:[%s4567_s0 + $0x78] sm:$0xff]  ;;  %v3453_v25 = vld [vmem:[%s4567_s0 + $0x80] sm:$0xff]  ;;  %v3465_v27 = vld [vmem:[%s4567_s0 + $0x90] sm:$0xff] }
  0x13   :  { %2610 = vmatpush1.bf16.msra.mxu0 %v2609_v38  ;;  %v2983_v24 = vpack.i.bf16 %v3442_v23, %v3423_v19  ;;  %v2988_v26 = vpack.i.bf16 %v3453_v25, %v3442_v23  ;;  %v3470_v28 = vld [vmem:[%s4567_s0 + $0x88] sm:$0xff]  ;;  %v3484_v32 = vld [vmem:[%s4567_s0 + $0x98] sm:$0xff]  ;;  %v3495_v34 = vld [vmem:[%s4567_s0 + $0xa0] sm:$0xff] }
  0x14   :  { %327 = vrot.lane.b32.xlu1 %v3291_v31, %s3105_s30  ;;  %2612 = vmatprep.subr.bf16.mxu0 %v2611_v39  ;;  %v3003_v29 = vpack.i.bf16 %v3465_v27, %v3470_v28  ;;  %v2998_v30 = vpack.i.bf16 %v3470_v28, %v3453_v25  ;;  %v3013_v33 = vpack.i.bf16 %v3484_v32, %v3465_v27  ;;  %v3507_v36 = vld [vmem:[%s4567_s0 + $0xb0] sm:$0xff]  ;;  %v3526_v40 = vld [vmem:[%s4567_s0 + $0xb8] sm:$0xff]  ;;  %v74_v43 = vld [vmem:[%s4567_s0 + $0xc0] sm:$0xff] }
  0x15   :  { %325 = vrot.lane.b32.xlu0 %v3232_v8, %s3105_s30  ;;  %v3018_v35 = vpack.i.bf16 %v3495_v34, %v3484_v32  ;;  %v3043_v41 = vpack.i.bf16 %v3526_v40, %v3507_v36  ;;  %v3048_v44 = vpack.i.bf16 %v74_v43, %v3526_v40  ;;  %v879_v48 = vld [vmem:[%s4569_s3 + $0x8] sm:$0xff]  ;;  %v880_v49 = vld [vmem:[%s4569_s3 + $0x10] sm:$0xff]  ;;  %v881_v51 = vld [vmem:[%s4569_s3 + $0x18] sm:$0xff] }
  0x16   :  { %v2637_v55 = vpack.c.bf16 %v881_v51, %v880_v49  ;;  %v882_v58 = vld [vmem:[%s4569_s3 + $0x20] sm:$0xff]  ;;  %v883_v59 = vld [vmem:[%s4569_s3 + $0x28] sm:$0xff]  ;;  %v884_v7 = vld [vmem:[%s4569_s3 + $0x30] sm:$0xff] }
  0x17   :  { %2614 = vmatpush1.bf16.msra.mxu0 %v2613_v45  ;;  %v75_v45 = vld [vmem:[%s4567_s0 + $0xc8] sm:$0xff]  ;;  %v2640_v5 = vpack.c.bf16 %v883_v59, %v882_v58  ;;  %v889_v49 = vld [vmem:[%s4569_s3 + $0x58] sm:$0xff] }
  0x18   :  { %2924 = vrot.lane.b32.xlu1 %v2923_v37, %s3106_s22  ;;  %2616 = vmatprep.subr.bf16.mxu0 %v2615_v47  ;;  %v3512_v37 = vld [vmem:[%s4567_s0 + $0xa8] sm:$0xff]  ;;  %v878_v47 = vld [vmem:[%s4569_s3] sm:$0xff] }
  0x19   :  { %2919 = vrot.lane.b32.xlu0 %v2913_v22, %s3104_s27  ;;  %v2968_v22 = vpack.i.bf16 %v3428_v20, %v3411_v17  ;;  %v3033_v38 = vpack.i.bf16 %v3507_v36, %v3512_v37  ;;  %v3028_v39 = vpack.i.bf16 %v3512_v37, %v3495_v34  ;;  %v2634_v50 = vpack.c.bf16 %v879_v48, %v878_v47  ;;  %v888_v48 = vld [vmem:[%s4569_s3 + $0x50] sm:$0xff] }
  0x1b   :  { %2618 = vmatpush1.bf16.msra.mxu0 %v2617_v52 }
  0x1c   :  { %329 = vrot.lane.b32.xlu1 %v3320_v42, %s3105_s30  ;;  %2620 = vmatprep.subr.bf16.mxu0 %v2619_v54  ;;  %v76_v54 = vld [vmem:[%s4567_s0 + $0xd0] sm:$0xff] }
  0x1d   :  { %2929 = vrot.lane.b32.xlu0 %v2928_v46, %s3103_s26 }
  0x1f   :  { %2622 = vmatpush1.bf16.msra.mxu0 %v2621_v61 }
  0x20   :  { %2934 = vrot.lane.b32.xlu1 %v2928_v46, %s3104_s27  ;;  %2624 = vmatprep.subr.bf16.mxu0 %v2623_v63  ;;  %v3108_v46 = vmov 0.0|0.0   ;;  %v50_v63 = vld [vmem:[%s4567_s0] sm:$0xff] }
  0x21   :  { %331 = vrot.lane.b32.xlu0 %v3361_v57, %s3105_s30  ;;  %2633 = vmatprep.subr.bf16.mxu1 %v3108_v46 }
  0x22   :  { %2635 = vmatpush1.bf16.msra.mxu1 %v2634_v50 }
  0x23   :  { %2626 = vmatpush1.bf16.msra.mxu0 %v2625_v9  ;;  %2636 = vmatprep.subr.bf16.mxu1 %v3108_v46  ;;  %v885_v9 = vld [vmem:[%s4569_s3 + $0x38] sm:$0xff] }
  0x24   :  { %2944 = vrot.lane.b32.xlu1 %v2943_v60, %s3103_s26  ;;  %2629 = vmatprep.subr.msk.bf16.mxu0 %vm2628_vm2, %v2627_v11 }
  0x25   :  { %2939 = vrot.lane.b32.xlu0 %v2938_v62, %s3106_s22  ;;  %v77_v62 = vld [vmem:[%s4567_s0 + $0xd8] sm:$0xff] }
  0x26   :  { %2638 = vmatpush1.bf16.msra.mxu1 %v2637_v55 }
  0x27   :  { %2632 = vmatpush1.bf16.msk.msra.mxu0 %vm2628_vm2, %v2630_v16  ;;  %2639 = vmatprep.subr.bf16.mxu1 %v3108_v46 }
  0x28   :  { %335 = vrot.lane.b32.xlu1 %v3393_v10, %s3105_s30 }
  0x29   :  { %333 = vrot.lane.b32.xlu0 %v3350_v53, %s3105_s30 }
  0x2a   :  { %2641 = vmatpush1.bf16.msra.mxu1 %v2640_v5 }
  0x2b   :  { %2642 = vmatprep.subr.bf16.mxu1 %v3108_v46 }
  0x2c   :  { %2954 = vrot.lane.b32.xlu1 %v2953_v14, %s3106_s22 }
  0x2d   :  { %2949 = vrot.lane.b32.xlu0 %v2943_v60, %s3104_s27 }
  0x30   :  { %337 = vrot.lane.b32.xlu1 %v3411_v17, %s3105_s30 }
  0x31   :  { %2959 = vrot.lane.b32.xlu0 %v2958_v18, %s3103_s26 }
  0x34   :  { %2964 = vrot.lane.b32.xlu1 %v2958_v18, %s3104_s27 }
  0x35   :  { %339 = vrot.lane.b32.xlu0 %v3428_v20, %s3105_s30 }
  0x38   :  { %2974 = vrot.lane.b32.xlu1 %v2973_v21, %s3103_s26 }
  0x39   :  { %2969 = vrot.lane.b32.xlu0 %v2968_v22, %s3106_s22 }
  0x3c   :  { %343 = vrot.lane.b32.xlu1 %v3442_v23, %s3105_s30 }
  0x3d   :  { %341 = vrot.lane.b32.xlu0 %v3423_v19, %s3105_s30 }
  0x40   :  { %2984 = vrot.lane.b32.xlu1 %v2983_v24, %s3106_s22  ;;  %v2643_v24 = vpack.c.bf16 %v885_v9, %v884_v7 }
  0x41   :  { %2979 = vrot.lane.b32.xlu0 %v2973_v21, %s3104_s27 }
  0x42   :  { %2644 = vmatpush1.bf16.msra.mxu1 %v2643_v24 }
  0x43   :  { %2645 = vmatprep.subr.bf16.mxu1 %v3108_v46 }
  0x44   :  { %345 = vrot.lane.b32.xlu1 %v3453_v25, %s3105_s30 }
  0x45   :  { %2989 = vrot.lane.b32.xlu0 %v2988_v26, %s3103_s26 }
  0x48   :  { %2994 = vrot.lane.b32.xlu1 %v2988_v26, %s3104_s27 }
  0x49   :  { %347 = vrot.lane.b32.xlu0 %v3470_v28, %s3105_s30 }
  0x4c   :  { %3004 = vrot.lane.b32.xlu1 %v3003_v29, %s3103_s26 }
  0x4d   :  { %2999 = vrot.lane.b32.xlu0 %v2998_v30, %s3106_s22 }
  0x50   :  { %351 = vrot.lane.b32.xlu1 %v3484_v32, %s3105_s30 }
  0x51   :  { %349 = vrot.lane.b32.xlu0 %v3465_v27, %s3105_s30 }
  0x54   :  { %3014 = vrot.lane.b32.xlu1 %v3013_v33, %s3106_s22  ;;  %v887_v33 = vld [vmem:[%s4569_s3 + $0x48] sm:$0xff] }
  0x55   :  { %3009 = vrot.lane.b32.xlu0 %v3003_v29, %s3104_s27 }
  0x58   :  { %353 = vrot.lane.b32.xlu1 %v3495_v34, %s3105_s30 }
  0x59   :  { %3019 = vrot.lane.b32.xlu0 %v3018_v35, %s3103_s26 }
  0x5c   :  { %3024 = vrot.lane.b32.xlu1 %v3018_v35, %s3104_s27 }
  0x5d   :  { %355 = vrot.lane.b32.xlu0 %v3512_v37, %s3105_s30 }
  0x60   :  { %3034 = vrot.lane.b32.xlu1 %v3033_v38, %s3103_s26 }
  0x61   :  { %3029 = vrot.lane.b32.xlu0 %v3028_v39, %s3106_s22 }
  0x64   :  { %359 = vrot.lane.b32.xlu1 %v3526_v40, %s3105_s30 }
  0x65   :  { %357 = vrot.lane.b32.xlu0 %v3507_v36, %s3105_s30 }
  0x68   :  { %3044 = vrot.lane.b32.xlu1 %v3043_v41, %s3106_s22 }
  0x69   :  { %3039 = vrot.lane.b32.xlu0 %v3033_v38, %s3104_s27 }
  0x6c   :  { %361 = vrot.lane.b32.xlu1 %v74_v43, %s3105_s30 }
  0x6d   :  { %3049 = vrot.lane.b32.xlu0 %v3048_v44, %s3103_s26 }
  0x70   :  { %3054 = vrot.lane.b32.xlu1 %v3048_v44, %s3104_s27 }
  0x71   :  { %363 = vrot.lane.b32.xlu0 %v75_v45, %s3105_s30 }
  0x74   :  { %292 = vrot.lane.b32.xlu1 %v75_v45, %s3103_s26 }
  0x75   :  { %219 = vrot.lane.b32.xlu0 %v74_v43, %s3106_s22 }
  0x76   :  { %v2900_v52 = vpop.permute.xlu1 %2899 }
  0x77   :  { %v2890_v56 = vpop.permute.xlu0 %2889  ;;  %v2901_v13 = vunpack.i.l.bf16 %v2900_v52  ;;  %v2902_v26 = vunpack.i.h.bf16 %v2900_v52 }
  0x78   :  { %221 = vrot.lane.b32.xlu1 %v75_v45, %s3106_s22  ;;  %v2892_v60 = vunpack.i.h.bf16 %v2890_v56  ;;  %v2891_v61 = vunpack.i.l.bf16 %v2890_v56 }
  0x79   :  { %365 = vrot.lane.b32.xlu0 %v76_v54, %s3105_s30 }
  0x7a   :  { %v322_v3 = vpop.permute.xlu1 %321  ;;  %v395_v14 = vsel %vm393_vm4, %v3209_v2, %v2892_v60  ;;  %v394_v16 = vsel %vm393_vm4, %v50_v63, %v2891_v61  ;;  %v886_v2 = vld [vmem:[%s4569_s3 + $0x40] sm:$0xff]  ;;  %v2649_v61 = vpack.c.bf16 %v889_v49, %v888_v48 }
  0x7b   :  { %v2895_v6 = vpop.permute.xlu0 %2894  ;;  %2180 = vmatprep.mubr.msk.f32.mxu0 %vm541_vm3, %v322_v3  ;;  %v2646_v44 = vpack.c.bf16 %v887_v33, %v886_v2 }
  0x7c   :  { %v2897_v11 = vunpack.i.h.bf16 %v2895_v6  ;;  %v2896_v12 = vunpack.i.l.bf16 %v2895_v6  ;;  %367 = vrot.lane.b32.xlu1 %v77_v62, %s3105_s30 }
  0x7d   :  { %294 = vrot.lane.b32.xlu0 %v76_v54, %s3103_s26  ;;  %2647 = vmatpush1.bf16.msra.mxu1 %v2646_v44 }
  0x7e   :  { %v2905_v18 = vpop.permute.xlu1 %2904  ;;  %v419_v21 = vsel %vm418_vm5, %v394_v16, %v2896_v12  ;;  %v420_v22 = vsel %vm418_vm5, %v395_v14, %v2897_v11  ;;  %2648 = vmatprep.subr.bf16.mxu1 %v3108_v46 }
  0x7f   :  { %v324_v29 = vpop.permute.xlu0 %323  ;;  %v444_v30 = vsel %vm443_vm6, %v419_v21, %v2901_v13  ;;  %v2907_v38 = vunpack.i.h.bf16 %v2905_v18  ;;  %v2906_v39 = vunpack.i.l.bf16 %v2905_v18  ;;  %v445_v41 = vsel %vm443_vm6, %v420_v22, %v2902_v26 }
  0x80   :  { %v469_v35 = vsel %vm468_vm7, %v444_v30, %v322_v3  ;;  %v470_v52 = vsel %vm468_vm7, %v445_v41, %v324_v29 }
  0x81   :  { %662 = vmatmul.mubr.f32.vlgmr.msra.gmra.mrb[0].mxu0 %v469_v35  ;;  %v397_v54 = vsel %vm393_vm4, %v3199_v0, %v2907_v38  ;;  %v396_v55 = vsel %vm393_vm4, %v3216_v4, %v2906_v39  ;;  %2650 = vmatpush1.bf16.msra.mxu1 %v2649_v61 }
  0x82   :  { %2181 = vmatprep.mubr.msk.f32.mxu0 %vm541_vm3, %v324_v29  ;;  %v2915_v43 = vpop.permute.xlu1 %2914  ;;  %2651 = vmatprep.subr.bf16.mxu1 %v3108_v46 }
  0x83   :  { %v2916_v45 = vunpack.i.l.bf16 %v2915_v43  ;;  %v2910_v47 = vpop.permute.xlu0 %2909  ;;  %v2917_v56 = vunpack.i.h.bf16 %v2915_v43 }
  0x84   :  { %v2912_v50 = vunpack.i.h.bf16 %v2910_v47  ;;  %v2911_v51 = vunpack.i.l.bf16 %v2910_v47 }
  0x85   :  { %668 = vmatmul.mubr.f32.gmra.mrb[2].mxu0 %v470_v52 }
  0x86   :  { %v328_v58 = vpop.permute.xlu1 %327  ;;  %v421_v59 = vsel %vm418_vm5, %v396_v55, %v2911_v51  ;;  %v422_v60 = vsel %vm418_vm5, %v397_v54, %v2912_v50 }
  0x87   :  { %v326_v62 = vpop.permute.xlu0 %325  ;;  %v446_v63 = vsel %vm443_vm6, %v421_v59, %v2916_v45  ;;  %v447_v4 = vsel %vm443_vm6, %v422_v60, %v2917_v56 }
  0x88   :  { %2182 = vmatprep.mubr.msk.f32.mxu0 %vm541_vm3, %v326_v62  ;;  %v471_v0 = vsel %vm468_vm7, %v446_v63, %v326_v62  ;;  %v472_v9 = vsel %vm468_vm7, %v447_v4, %v328_v58 }
  0x89   :  { %674 = vmatmul.mubr.f32.gmra.mrb[4].mxu0 %v471_v0 }
  0x8a   :  { %2183 = vmatprep.mubr.msk.f32.mxu0 %vm541_vm3, %v328_v58  ;;  %v2925_v3 = vpop.permute.xlu1 %2924 }
  0x8b   :  { %v2920_v5 = vpop.permute.xlu0 %2919  ;;  %v2926_v11 = vunpack.i.l.bf16 %v2925_v3  ;;  %v2927_v14 = vunpack.i.h.bf16 %v2925_v3 }
  0x8c   :  { %v2922_v6 = vunpack.i.h.bf16 %v2920_v5  ;;  %v2921_v7 = vunpack.i.l.bf16 %v2920_v5 }
  0x8d   :  { %680 = vmatmul.mubr.f32.gmra.mrb[6].mxu0 %v472_v9 }
  0x8e   :  { %v398_v12 = vsel %vm393_vm4, %v3204_v1, %v2921_v7  ;;  %v330_v13 = vpop.permute.xlu1 %329  ;;  %v399_v18 = vsel %vm393_vm4, %v3253_v15, %v2922_v6 }
  0x8f   :  { %v2930_v16 = vpop.permute.xlu0 %2929  ;;  %2184 = vmatprep.mubr.msk.f32.mxu0 %vm541_vm3, %v330_v13  ;;  %v423_v24 = vsel %vm418_vm5, %v398_v12, %v2926_v11  ;;  %v424_v1 = vsel %vm418_vm5, %v399_v18, %v2927_v14 }
  0x90   :  { %v2932_v21 = vunpack.i.h.bf16 %v2930_v16  ;;  %v2931_v22 = vunpack.i.l.bf16 %v2930_v16 }
  0x92   :  { %v2935_v26 = vpop.permute.xlu1 %2934  ;;  %v448_v29 = vsel %vm443_vm6, %v423_v24, %v2931_v22  ;;  %v449_v33 = vsel %vm443_vm6, %v424_v1, %v2932_v21 }
  0x93   :  { %v332_v30 = vpop.permute.xlu0 %331  ;;  %v473_v2 = vsel %vm468_vm7, %v448_v29, %v330_v13  ;;  %v2937_v35 = vunpack.i.h.bf16 %v2935_v26  ;;  %v2936_v38 = vunpack.i.l.bf16 %v2935_v26 }
  0x94   :  { %686 = vmatmul.mubr.f32.gmra.mrb[8].mxu0 %v473_v2  ;;  %v474_v43 = vsel %vm468_vm7, %v449_v33, %v332_v30 }
  0x95   :  { %2185 = vmatprep.mubr.msk.f32.mxu0 %vm541_vm3, %v332_v30  ;;  %v401_v47 = vsel %vm393_vm4, %v3291_v31, %v2937_v35  ;;  %v400_v48 = vsel %vm393_vm4, %v3232_v8, %v2936_v38 }
  0x96   :  { %v2945_v15 = vpop.permute.xlu1 %2944 }
  0x97   :  { %v2946_v39 = vunpack.i.l.bf16 %v2945_v15  ;;  %v2940_v41 = vpop.permute.xlu0 %2939  ;;  %v2947_v49 = vunpack.i.h.bf16 %v2945_v15 }
  0x98   :  { %v2942_v44 = vunpack.i.h.bf16 %v2940_v41  ;;  %v2941_v45 = vunpack.i.l.bf16 %v2940_v41  ;;  %692 = vmatmul.mubr.f32.gmra.mrb[10].mxu0 %v474_v43 }
  0x9a   :  { %v336_v50 = vpop.permute.xlu1 %335  ;;  %v425_v51 = vsel %vm418_vm5, %v400_v48, %v2941_v45  ;;  %v426_v52 = vsel %vm418_vm5, %v401_v47, %v2942_v44 }
  0x9b   :  { %v334_v54 = vpop.permute.xlu0 %333  ;;  %v450_v55 = vsel %vm443_vm6, %v425_v51, %v2946_v39  ;;  %v451_v58 = vsel %vm443_vm6, %v426_v52, %v2947_v49 }
  0x9c   :  { %2186 = vmatprep.mubr.msk.f32.mxu0 %vm541_vm3, %v334_v54  ;;  %v475_v56 = vsel %vm468_vm7, %v450_v55, %v334_v54  ;;  %v476_v61 = vsel %vm468_vm7, %v451_v58, %v336_v50 }
  0x9d   :  { %698 = vmatmul.mubr.f32.gmra.mrb[12].mxu0 %v475_v56 }
  0x9e   :  { %2187 = vmatprep.mubr.msk.f32.mxu0 %vm541_vm3, %v336_v50  ;;  %v2955_v31 = vpop.permute.xlu1 %2954 }
  0x9f   :  { %v2950_v8 = vpop.permute.xlu0 %2949  ;;  %v2956_v62 = vunpack.i.l.bf16 %v2955_v31  ;;  %v2957_v4 = vunpack.i.h.bf16 %v2955_v31 }
  0xa0   :  { %v2952_v59 = vunpack.i.h.bf16 %v2950_v8  ;;  %v2951_v60 = vunpack.i.l.bf16 %v2950_v8 }
  0xa1   :  { %704 = vmatmul.mubr.f32.gmra.mrb[14].mxu0 %v476_v61 }
  0xa2   :  { %v402_v63 = vsel %vm393_vm4, %v3320_v42, %v2951_v60  ;;  %v338_v0 = vpop.permute.xlu1 %337  ;;  %v403_v5 = vsel %vm393_vm4, %v3361_v57, %v2952_v59 }
  0xa3   :  { %v2960_v3 = vpop.permute.xlu0 %2959  ;;  %2188 = vmatprep.mubr.msk.f32.mxu0 %vm541_vm3, %v338_v0  ;;  %v427_v9 = vsel %vm418_vm5, %v402_v63, %v2956_v62  ;;  %v428_v42 = vsel %vm418_vm5, %v403_v5, %v2957_v4 }
  0xa4   :  { %v2962_v6 = vunpack.i.h.bf16 %v2960_v3  ;;  %v2961_v7 = vunpack.i.l.bf16 %v2960_v3 }
  0xa6   :  { %v2965_v11 = vpop.permute.xlu1 %2964  ;;  %v452_v12 = vsel %vm443_vm6, %v427_v9, %v2961_v7  ;;  %v453_v16 = vsel %vm443_vm6, %v428_v42, %v2962_v6 }
  0xa7   :  { %v340_v13 = vpop.permute.xlu0 %339  ;;  %v477_v14 = vsel %vm468_vm7, %v452_v12, %v338_v0  ;;  %v2967_v18 = vunpack.i.h.bf16 %v2965_v11  ;;  %v2966_v21 = vunpack.i.l.bf16 %v2965_v11 }
  0xa8   :  { %710 = vmatmul.mubr.f32.gmra.mrb[16].mxu0 %v477_v14  ;;  %v478_v26 = vsel %vm468_vm7, %v453_v16, %v340_v13 }
  0xa9   :  { %2189 = vmatprep.mubr.msk.f32.mxu0 %vm541_vm3, %v340_v13  ;;  %v405_v2 = vsel %vm393_vm4, %v3393_v10, %v2967_v18  ;;  %v404_v1 = vsel %vm393_vm4, %v3350_v53, %v2966_v21 }
  0xaa   :  { %v2975_v57 = vpop.permute.xlu1 %2974 }
  0xab   :  { %v2976_v22 = vunpack.i.l.bf16 %v2975_v57  ;;  %v2970_v24 = vpop.permute.xlu0 %2969  ;;  %v2977_v33 = vunpack.i.h.bf16 %v2975_v57 }
  0xac   :  { %v2972_v29 = vunpack.i.h.bf16 %v2970_v24  ;;  %v2971_v30 = vunpack.i.l.bf16 %v2970_v24  ;;  %716 = vmatmul.mubr.f32.gmra.mrb[18].mxu0 %v478_v26 }
  0xae   :  { %v344_v35 = vpop.permute.xlu1 %343  ;;  %v429_v38 = vsel %vm418_vm5, %v404_v1, %v2971_v30  ;;  %v430_v15 = vsel %vm418_vm5, %v405_v2, %v2972_v29 }
  0xaf   :  { %v342_v39 = vpop.permute.xlu0 %341  ;;  %v454_v41 = vsel %vm443_vm6, %v429_v38, %v2976_v22  ;;  %v455_v44 = vsel %vm443_vm6, %v430_v15, %v2977_v33 }
  0xb0   :  { %2190 = vmatprep.mubr.msk.f32.mxu0 %vm541_vm3, %v342_v39  ;;  %v479_v43 = vsel %vm468_vm7, %v454_v41, %v342_v39  ;;  %v480_v48 = vsel %vm468_vm7, %v455_v44, %v344_v35 }
  0xb1   :  { %722 = vmatmul.mubr.f32.gmra.mrb[20].mxu0 %v479_v43 }
  0xb2   :  { %2191 = vmatprep.mubr.msk.f32.mxu0 %vm541_vm3, %v344_v35  ;;  %v2985_v10 = vpop.permute.xlu1 %2984 }
  0xb3   :  { %v2980_v53 = vpop.permute.xlu0 %2979  ;;  %v2986_v49 = vunpack.i.l.bf16 %v2985_v10  ;;  %v2987_v52 = vunpack.i.h.bf16 %v2985_v10 }
  0xb4   :  { %v2982_v45 = vunpack.i.h.bf16 %v2980_v53  ;;  %v2981_v47 = vunpack.i.l.bf16 %v2980_v53 }
  0xb5   :  { %728 = vmatmul.mubr.f32.gmra.mrb[22].mxu0 %v480_v48 }
  0xb6   :  { %v406_v50 = vsel %vm393_vm4, %v3411_v17, %v2981_v47  ;;  %v346_v51 = vpop.permute.xlu1 %345  ;;  %v407_v55 = vsel %vm393_vm4, %v3428_v20, %v2982_v45 }
  0xb7   :  { %v2990_v54 = vpop.permute.xlu0 %2989  ;;  %2192 = vmatprep.mubr.msk.f32.mxu0 %vm541_vm3, %v346_v51  ;;  %v431_v31 = vsel %vm418_vm5, %v406_v50, %v2986_v49  ;;  %v432_v17 = vsel %vm418_vm5, %v407_v55, %v2987_v52  ;;  %v891_v52 = vld [vmem:[%s4569_s3 + $0x68] sm:$0xff] }
  0xb8   :  { %v2992_v56 = vunpack.i.h.bf16 %v2990_v54  ;;  %v2991_v58 = vunpack.i.l.bf16 %v2990_v54 }
  0xba   :  { %v2995_v8 = vpop.permute.xlu1 %2994  ;;  %v456_v59 = vsel %vm443_vm6, %v431_v31, %v2991_v58  ;;  %v457_v62 = vsel %vm443_vm6, %v432_v17, %v2992_v56 }
  0xbb   :  { %v348_v60 = vpop.permute.xlu0 %347  ;;  %v481_v61 = vsel %vm468_vm7, %v456_v59, %v346_v51  ;;  %v2997_v63 = vunpack.i.h.bf16 %v2995_v8  ;;  %v2996_v0 = vunpack.i.l.bf16 %v2995_v8  ;;  %v890_v51 = vld [vmem:[%s4569_s3 + $0x60] sm:$0xff] }
  0xbc   :  { %734 = vmatmul.mubr.f32.gmra.mrb[24].mxu0 %v481_v61  ;;  %v482_v5 = vsel %vm468_vm7, %v457_v62, %v348_v60  ;;  %v2652_v56 = vpack.c.bf16 %v891_v52, %v890_v51 }
  0xbd   :  { %2193 = vmatprep.mubr.msk.f32.mxu0 %vm541_vm3, %v348_v60  ;;  %v409_v9 = vsel %vm393_vm4, %v3442_v23, %v2997_v63  ;;  %v408_v11 = vsel %vm393_vm4, %v3423_v19, %v2996_v0  ;;  %v892_v63 = vld [vmem:[%s4569_s3 + $0x70] sm:$0xff] }
  0xbe   :  { %v3005_v20 = vpop.permute.xlu1 %3004  ;;  %2653 = vmatpush1.bf16.msra.mxu1 %v2652_v56 }
  0xbf   :  { %v3006_v4 = vunpack.i.l.bf16 %v3005_v20  ;;  %v3000_v3 = vpop.permute.xlu0 %2999  ;;  %v3007_v12 = vunpack.i.h.bf16 %v3005_v20  ;;  %2654 = vmatprep.subr.bf16.mxu1 %v3108_v46 }
  0xc0   :  { %v3002_v6 = vunpack.i.h.bf16 %v3000_v3  ;;  %v3001_v7 = vunpack.i.l.bf16 %v3000_v3  ;;  %740 = vmatmul.mubr.f32.gmra.mrb[26].mxu0 %v482_v5  ;;  %v894_v5 = vld [vmem:[%s4569_s3 + $0x80] sm:$0xff] }
  0xc2   :  { %v352_v13 = vpop.permute.xlu1 %351  ;;  %v433_v14 = vsel %vm418_vm5, %v408_v11, %v3001_v7  ;;  %v434_v42 = vsel %vm418_vm5, %v409_v9, %v3002_v6  ;;  %v895_v6 = vld [vmem:[%s4569_s3 + $0x88] sm:$0xff] }
  0xc3   :  { %v350_v16 = vpop.permute.xlu0 %349  ;;  %v458_v18 = vsel %vm443_vm6, %v433_v14, %v3006_v4  ;;  %v459_v57 = vsel %vm443_vm6, %v434_v42, %v3007_v12  ;;  %v2658_v12 = vpack.c.bf16 %v895_v6, %v894_v5 }
  0xc4   :  { %2194 = vmatprep.mubr.msk.f32.mxu0 %vm541_vm3, %v350_v16  ;;  %v483_v21 = vsel %vm468_vm7, %v458_v18, %v350_v16  ;;  %v484_v26 = vsel %vm468_vm7, %v459_v57, %v352_v13 }
  0xc5   :  { %746 = vmatmul.mubr.f32.gmra.mrb[28].mxu0 %v483_v21 }
  0xc6   :  { %2195 = vmatprep.mubr.msk.f32.mxu0 %vm541_vm3, %v352_v13  ;;  %v3015_v23 = vpop.permute.xlu1 %3014 }
  0xc7   :  { %v3010_v19 = vpop.permute.xlu0 %3009  ;;  %v3016_v29 = vunpack.i.l.bf16 %v3015_v23  ;;  %v3017_v1 = vunpack.i.h.bf16 %v3015_v23 }
  0xc8   :  { %v3012_v22 = vunpack.i.h.bf16 %v3010_v19  ;;  %v3011_v24 = vunpack.i.l.bf16 %v3010_v19 }
  0xc9   :  { %752 = vmatmul.mubr.f32.gmra.mrb[30].mxu0 %v484_v26 }
  0xca   :  { %v410_v30 = vsel %vm393_vm4, %v3453_v25, %v3011_v24  ;;  %v354_v2 = vpop.permute.xlu1 %353  ;;  %v411_v35 = vsel %vm393_vm4, %v3470_v28, %v3012_v22 }
  0xcb   :  { %v3020_v33 = vpop.permute.xlu0 %3019  ;;  %2196 = vmatprep.mubr.msk.f32.mxu0 %vm541_vm3, %v354_v2  ;;  %v435_v39 = vsel %vm418_vm5, %v410_v30, %v3016_v29  ;;  %v436_v25 = vsel %vm418_vm5, %v411_v35, %v3017_v1 }
  0xcc   :  { %v3022_v38 = vunpack.i.h.bf16 %v3020_v33  ;;  %v3021_v15 = vunpack.i.l.bf16 %v3020_v33 }
  0xce   :  { %v3025_v41 = vpop.permute.xlu1 %3024  ;;  %v460_v43 = vsel %vm443_vm6, %v435_v39, %v3021_v15  ;;  %v461_v53 = vsel %vm443_vm6, %v436_v25, %v3022_v38 }
  0xcf   :  { %v356_v44 = vpop.permute.xlu0 %355  ;;  %v485_v10 = vsel %vm468_vm7, %v460_v43, %v354_v2  ;;  %v3027_v45 = vunpack.i.h.bf16 %v3025_v41  ;;  %v3026_v47 = vunpack.i.l.bf16 %v3025_v41 }
  0xd0   :  { %758 = vmatmul.mubr.f32.gmra.mrb[32].mxu0 %v485_v10  ;;  %v486_v50 = vsel %vm468_vm7, %v461_v53, %v356_v44 }
  0xd1   :  { %2197 = vmatprep.mubr.msk.f32.mxu0 %vm541_vm3, %v356_v44  ;;  %v413_v58 = vsel %vm393_vm4, %v3484_v32, %v3027_v45  ;;  %v412_v31 = vsel %vm393_vm4, %v3465_v27, %v3026_v47  ;;  %v893_v27 = vld [vmem:[%s4569_s3 + $0x78] sm:$0xff] }
  0xd2   :  { %v3035_v28 = vpop.permute.xlu1 %3034  ;;  %v2655_v0 = vpack.c.bf16 %v893_v27, %v892_v63  ;;  %v1059_v63 = vld [vmem:[%s4571_s4 + $0x8] sm:$0xff] }
  0xd3   :  { %v3036_v48 = vunpack.i.l.bf16 %v3035_v28  ;;  %v3030_v49 = vpop.permute.xlu0 %3029  ;;  %v3037_v8 = vunpack.i.h.bf16 %v3035_v28  ;;  %v531_v28 = vlaneseq }
  0xd4   :  { %v3032_v54 = vunpack.i.h.bf16 %v3030_v49  ;;  %v3031_v55 = vunpack.i.l.bf16 %v3030_v49  ;;  %764 = vmatmul.mubr.f32.gmra.mrb[34].mxu0 %v486_v50  ;;  %2656 = vmatpush1.bf16.msra.mxu1 %v2655_v0  ;;  %v529_v50 = vld [vmem:[%s4570_s2] sm:$0x3] }
  0xd5   :  { %2657 = vmatprep.subr.bf16.mxu1 %v3108_v46 }
  0xd6   :  { %v360_v59 = vpop.permute.xlu1 %359  ;;  %v437_v60 = vsel %vm418_vm5, %v412_v31, %v3031_v55  ;;  %v438_v61 = vsel %vm418_vm5, %v413_v58, %v3032_v54 }
  0xd7   :  { %v358_v17 = vpop.permute.xlu0 %357  ;;  %v462_v62 = vsel %vm443_vm6, %v437_v60, %v3036_v48  ;;  %v463_v20 = vsel %vm443_vm6, %v438_v61, %v3037_v8  ;;  %v532_v48 = vshrl.u32 %v531_v28, 7  ;;  %v1069_v28 = vld [vmem:[%s4571_s4 + $0x58] sm:$0xff] }
  0xd8   :  { %2198 = vmatprep.mubr.msk.f32.mxu0 %vm541_vm3, %v358_v17  ;;  %v487_v32 = vsel %vm468_vm7, %v462_v62, %v358_v17  ;;  %v488_v11 = vsel %vm468_vm7, %v463_v20, %v360_v59  ;;  %2659 = vmatpush1.bf16.msra.mxu1 %v2658_v12  ;;  %v1058_v62 = vld [vmem:[%s4571_s4] sm:$0xff] }
  0xd9   :  { %770 = vmatmul.mubr.f32.gmra.mrb[36].mxu0 %v487_v32  ;;  %2660 = vmatprep.subr.bf16.mxu1 %v3108_v46  ;;  %v533_v49 = vsub.s32 0, %v532_v48  ;;  %v537_v51 = vsub.s32 1, %v532_v48  ;;  %v2661_v5 = vpack.c.bf16 %v1059_v63, %v1058_v62 }
  0xda   :  { %2199 = vmatprep.mubr.msk.f32.mxu0 %vm541_vm3, %v360_v59  ;;  %v3045_v4 = vpop.permute.xlu1 %3044 }
  0xdb   :  { %v3040_v3 = vpop.permute.xlu0 %3039  ;;  %v3046_v13 = vunpack.i.l.bf16 %v3045_v4  ;;  %v3047_v16 = vunpack.i.h.bf16 %v3045_v4  ;;  %v3774_v54 = vrot.slane %v529_v50, %v537_v51 }
  0xdc   :  { %v3042_v7 = vunpack.i.h.bf16 %v3040_v3  ;;  %v3041_v9 = vunpack.i.l.bf16 %v3040_v3 }
  0xdd   :  { %776 = vmatmul.mubr.f32.gmra.mrb[38].mxu0 %v488_v11 }
  0xde   :  { %v414_v14 = vsel %vm393_vm4, %v3495_v34, %v3041_v9  ;;  %v362_v42 = vpop.permute.xlu1 %361  ;;  %v415_v21 = vsel %vm393_vm4, %v3512_v37, %v3042_v7  ;;  %v1060_v7 = vld [vmem:[%s4571_s4 + $0x10] sm:$0xff]  ;;  %v1061_v9 = vld [vmem:[%s4571_s4 + $0x18] sm:$0xff] }
  0xdf   :  { %v3050_v18 = vpop.permute.xlu0 %3049  ;;  %2200 = vmatprep.mubr.msk.f32.mxu0 %vm541_vm3, %v362_v42  ;;  %v439_v19 = vsel %vm418_vm5, %v414_v14, %v3046_v13  ;;  %v440_v30 = vsel %vm418_vm5, %v415_v21, %v3047_v16  ;;  %v2664_v16 = vpack.c.bf16 %v1061_v9, %v1060_v7 }
  0xe0   :  { %v3052_v57 = vunpack.i.h.bf16 %v3050_v18  ;;  %v3051_v23 = vunpack.i.l.bf16 %v3050_v18 }
  0xe2   :  { %v3055_v22 = vpop.permute.xlu1 %3054  ;;  %v464_v24 = vsel %vm443_vm6, %v439_v19, %v3051_v23  ;;  %v465_v2 = vsel %vm443_vm6, %v440_v30, %v3052_v57  ;;  %v1062_v57 = vld [vmem:[%s4571_s4 + $0x20] sm:$0xff]  ;;  %v1063_v23 = vld [vmem:[%s4571_s4 + $0x28] sm:$0xff]  ;;  %v1064_v30 = vld [vmem:[%s4571_s4 + $0x30] sm:$0xff] }
  0xe3   :  { %v3056_v26 = vunpack.i.l.bf16 %v3055_v22  ;;  %v364_v34 = vpop.permute.xlu0 %363  ;;  %v489_v29 = vsel %vm468_vm7, %v464_v24, %v362_v42  ;;  %v3057_v15 = vunpack.i.h.bf16 %v3055_v22 }
  0xe4   :  { %782 = vmatmul.mubr.f32.gmra.mrb[40].mxu0 %v489_v29  ;;  %v490_v35 = vsel %vm468_vm7, %v465_v2, %v364_v34  ;;  %v1065_v2 = vld [vmem:[%s4571_s4 + $0x38] sm:$0xff] }
  0xe5   :  { %2201 = vmatprep.mubr.msk.f32.mxu0 %vm541_vm3, %v364_v34  ;;  %v416_v37 = vsel %vm393_vm4, %v3507_v36, %v3056_v26  ;;  %v417_v36 = vsel %vm393_vm4, %v3526_v40, %v3057_v15  ;;  %v3772_v40 = vrot.slane %v529_v50, %v533_v49  ;;  %v2667_v34 = vpack.c.bf16 %v1063_v23, %v1062_v57  ;;  %v1066_v15 = vld [vmem:[%s4571_s4 + $0x40] sm:$0xff] }
  0xe6   :  { %v293_v1 = vpop.permute.xlu1 %292 }
  0xe7   :  { %v220_v33 = vpop.permute.xlu0 %219 }
  0xe8   :  { %v441_v38 = vsel %vm418_vm5, %v416_v37, %v220_v33  ;;  %788 = vmatmul.mubr.f32.gmra.mrb[42].mxu0 %v490_v35  ;;  %v2670_v33 = vpack.c.bf16 %v1065_v2, %v1064_v30 }
  0xe9   :  { %v466_v43 = vsel %vm443_vm6, %v441_v38, %v293_v1 }
  0xea   :  { %v222_v39 = vpop.permute.xlu1 %221 }
  0xeb   :  { %v366_v41 = vpop.permute.xlu0 %365  ;;  %v442_v25 = vsel %vm418_vm5, %v417_v36, %v222_v39  ;;  %v1067_v39 = vld [vmem:[%s4571_s4 + $0x48] sm:$0xff] }
  0xec   :  { %2202 = vmatprep.mubr.msk.f32.mxu0 %vm541_vm3, %v366_v41  ;;  %v491_v44 = vsel %vm468_vm7, %v466_v43, %v366_v41 }
  0xed   :  { %794 = vmatmul.mubr.f32.gmra.mrb[44].mxu0 %v491_v44 }
  0xee   :  { %v368_v10 = vpop.permute.xlu1 %367 }
  0xef   :  { %v295_v53 = vpop.permute.xlu0 %294  ;;  %2203 = vmatprep.mubr.msk.f32.mxu0 %vm541_vm3, %v368_v10 }
  0xf0   :  { %v467_v45 = vsel %vm443_vm6, %v442_v25, %v295_v53  ;;  %v2673_v25 = vpack.c.bf16 %v1067_v39, %v1066_v15 }
  0xf1   :  { %v492_v47 = vsel %vm468_vm7, %v467_v45, %v368_v10 }
  0xf2   :  { %800 = vmatmul.mubr.f32.gmra.mrb[46].mxu0 %v492_v47  ;;  %v1068_v47 = vld [vmem:[%s4571_s4 + $0x50] sm:$0xff] }
 0x154   :  { %v663_v52 = vpop.f32.mrb[0].mxu0 }
 0x155   :  { %v665_v55 = vpop.f32.mrb[1].mxu0  ;;  %v664_v56 = vadd.f32 %v663_v52, %v3772_v40  ;;  %v2676_v52 = vpack.c.bf16 %v1069_v28, %v1068_v47 }
 0x156   :  { %v666_v58 = vadd.f32 %v665_v55, %v3774_v54 }
 0x157   :  { %v806_v61 = vmax.f32 %v664_v56, 0.0  ;;  %v1070_v56 = vld [vmem:[%s4571_s4 + $0x60] sm:$0xff] }
 0x158   :  { %v669_v31 = vpop.f32.mrb[2].mxu0  ;;  %v807_v27 = vmax.f32 %v666_v58, 0.0  ;;  %v1071_v58 = vld [vmem:[%s4571_s4 + $0x68] sm:$0xff] }
 0x159   :  { %v670_v8 = vadd.f32 %v669_v31, %v3772_v40  ;;  %v671_v59 = vpop.f32.mrb[3].mxu0 }
 0x15a   :  { %v672_v60 = vadd.f32 %v671_v59, %v3774_v54 }
 0x15b   :  { %v808_v17 = vmax.f32 %v670_v8, 0.0 }
 0x15c   :  { %v809_v32 = vmax.f32 %v672_v60, 0.0  ;;  %v675_v0 = vpop.f32.mrb[4].mxu0 }
 0x15d   :  { %v3786_v20 = vmax.f32 %v806_v61, %v808_v17  ;;  %v677_v4 = vpop.f32.mrb[5].mxu0  ;;  %v676_v6 = vadd.f32 %v675_v0, %v3772_v40  ;;  %v2679_v17 = vpack.c.bf16 %v1071_v58, %v1070_v56 }
 0x15e   :  { %v3788_v3 = vmax.f32 %v807_v27, %v809_v32  ;;  %v678_v11 = vadd.f32 %v677_v4, %v3774_v54  ;;  %v1072_v27 = vld [vmem:[%s4571_s4 + $0x70] sm:$0xff]  ;;  %v1073_v32 = vld [vmem:[%s4571_s4 + $0x78] sm:$0xff] }
 0x15f   :  { %v810_v18 = vmax.f32 %v676_v6, 0.0  ;;  %v2682_v7 = vpack.c.bf16 %v1073_v32, %v1072_v27 }
 0x160   :  { %v681_v12 = vpop.f32.mrb[6].mxu0  ;;  %2204 = vmatprep.mubr.msk.f32.mxu1 %vm896_vm8, %v3788_v3  ;;  %v811_v19 = vmax.f32 %v678_v11, 0.0  ;;  %v1074_v11 = vld [vmem:[%s4571_s4 + $0x80] sm:$0xff] }
 0x161   :  { %v682_v13 = vadd.f32 %v681_v12, %v3772_v40  ;;  %v683_v14 = vpop.f32.mrb[7].mxu0  ;;  %998 = vmatmul.mubr.f32.vlgmr.msra.gmra.mrb[0].mxu1 %v3786_v20  ;;  %v1075_v12 = vld [vmem:[%s4571_s4 + $0x88] sm:$0xff] }
 0x162   :  { %v684_v42 = vadd.f32 %v683_v14, %v3774_v54  ;;  %2662 = vmatpush1.bf16.msra.mxu1 %v2661_v5 }
 0x163   :  { %v812_v21 = vmax.f32 %v682_v13, 0.0  ;;  %2663 = vmatprep.subr.bf16.mxu1 %v3108_v46 }
 0x164   :  { %v813_v22 = vmax.f32 %v684_v42, 0.0  ;;  %v2685_v42 = vpack.c.bf16 %v1075_v12, %v1074_v11 }
 0x165   :  { %v3810_v24 = vmax.f32 %v810_v18, %v812_v21 }
 0x166   :  { %v3812_v26 = vmax.f32 %v811_v19, %v813_v22  ;;  %2665 = vmatpush1.bf16.msra.mxu1 %v2664_v16 }
 0x167   :  { %v687_v29 = vpop.f32.mrb[8].mxu0  ;;  %2666 = vmatprep.subr.bf16.mxu1 %v3108_v46 }
 0x168   :  { %v689_v37 = vpop.f32.mrb[9].mxu0  ;;  %2205 = vmatprep.mubr.msk.f32.mxu1 %vm896_vm8, %v3812_v26  ;;  %v688_v1 = vadd.f32 %v687_v29, %v3772_v40 }
 0x169   :  { %1003 = vmatmul.mubr.f32.gmra.mrb[2].mxu1 %v3810_v24  ;;  %v690_v35 = vadd.f32 %v689_v37, %v3774_v54 }
 0x16a   :  { %2668 = vmatpush1.bf16.msra.mxu1 %v2667_v34  ;;  %v814_v36 = vmax.f32 %v688_v1, 0.0 }
 0x16b   :  { %v693_v38 = vpop.f32.mrb[10].mxu0  ;;  %2669 = vmatprep.subr.bf16.mxu1 %v3108_v46  ;;  %v815_v53 = vmax.f32 %v690_v35, 0.0 }
 0x16c   :  { %v694_v41 = vadd.f32 %v693_v38, %v3772_v40  ;;  %v695_v43 = vpop.f32.mrb[11].mxu0 }
 0x16d   :  { %v696_v44 = vadd.f32 %v695_v43, %v3774_v54 }
 0x16e   :  { %v816_v10 = vmax.f32 %v694_v41, 0.0  ;;  %2671 = vmatpush1.bf16.msra.mxu1 %v2670_v33 }
 0x16f   :  { %v817_v45 = vmax.f32 %v696_v44, 0.0  ;;  %2672 = vmatprep.subr.bf16.mxu1 %v3108_v46 }
 0x170   :  { %v3842_v48 = vmax.f32 %v814_v36, %v816_v10  ;;  %v699_v49 = vpop.f32.mrb[12].mxu0 }
 0x171   :  { %v3844_v50 = vmax.f32 %v815_v53, %v817_v45  ;;  %v701_v51 = vpop.f32.mrb[13].mxu0  ;;  %v700_v55 = vadd.f32 %v699_v49, %v3772_v40 }
 0x172   :  { %2674 = vmatpush1.bf16.msra.mxu1 %v2673_v25  ;;  %v702_v31 = vadd.f32 %v701_v51, %v3774_v54 }
 0x173   :  { %2206 = vmatprep.mubr.msk.f32.mxu1 %vm896_vm8, %v3844_v50  ;;  %2675 = vmatprep.subr.bf16.mxu1 %v3108_v46  ;;  %v818_v62 = vmax.f32 %v700_v55, 0.0 }
 0x174   :  { %v705_v8 = vpop.f32.mrb[14].mxu0  ;;  %1008 = vmatmul.mubr.f32.gmra.mrb[4].mxu1 %v3842_v48  ;;  %v819_v0 = vmax.f32 %v702_v31, 0.0 }
 0x175   :  { %v706_v59 = vadd.f32 %v705_v8, %v3772_v40  ;;  %v707_v60 = vpop.f32.mrb[15].mxu0 }
 0x176   :  { %v708_v61 = vadd.f32 %v707_v60, %v3774_v54  ;;  %2677 = vmatpush1.bf16.msra.mxu1 %v2676_v52 }
 0x177   :  { %v820_v63 = vmax.f32 %v706_v59, 0.0  ;;  %2678 = vmatprep.subr.bf16.mxu1 %v3108_v46 }
 0x178   :  { %v821_v4 = vmax.f32 %v708_v61, 0.0 }
 0x179   :  { %v3867_v5 = vmax.f32 %v818_v62, %v820_v63 }
 0x17a   :  { %v3869_v6 = vmax.f32 %v819_v0, %v821_v4  ;;  %2680 = vmatpush1.bf16.msra.mxu1 %v2679_v17 }
 0x17b   :  { %v711_v9 = vpop.f32.mrb[16].mxu0  ;;  %2681 = vmatprep.subr.bf16.mxu1 %v3108_v46 }
 0x17c   :  { %v713_v13 = vpop.f32.mrb[17].mxu0  ;;  %2207 = vmatprep.mubr.msk.f32.mxu1 %vm896_vm8, %v3869_v6  ;;  %v712_v14 = vadd.f32 %v711_v9, %v3772_v40 }
 0x17d   :  { %1013 = vmatmul.mubr.f32.gmra.mrb[6].mxu1 %v3867_v5  ;;  %v714_v16 = vadd.f32 %v713_v13, %v3774_v54 }
 0x17e   :  { %2683 = vmatpush1.bf16.msra.mxu1 %v2682_v7  ;;  %v822_v19 = vmax.f32 %v712_v14, 0.0 }
 0x17f   :  { %v717_v18 = vpop.f32.mrb[18].mxu0  ;;  %2684 = vmatprep.subr.bf16.mxu1 %v3108_v46  ;;  %v823_v34 = vmax.f32 %v714_v16, 0.0 }
 0x180   :  { %v718_v21 = vadd.f32 %v717_v18, %v3772_v40  ;;  %v719_v57 = vpop.f32.mrb[19].mxu0 }
 0x181   :  { %v720_v23 = vadd.f32 %v719_v57, %v3774_v54 }
 0x182   :  { %v824_v22 = vmax.f32 %v718_v21, 0.0  ;;  %2686 = vmatpush1.bf16.msra.mxu1 %v2685_v42 }
 0x183   :  { %v825_v29 = vmax.f32 %v720_v23, 0.0 }
 0x184   :  { %v3886_v30 = vmax.f32 %v822_v19, %v824_v22  ;;  %v723_v2 = vpop.f32.mrb[20].mxu0 }
 0x185   :  { %v3888_v37 = vmax.f32 %v823_v34, %v825_v29  ;;  %v725_v1 = vpop.f32.mrb[21].mxu0  ;;  %v724_v33 = vadd.f32 %v723_v2, %v3772_v40 }
 0x186   :  { %v726_v35 = vadd.f32 %v725_v1, %v3774_v54 }
 0x187   :  { %2208 = vmatprep.mubr.msk.f32.mxu1 %vm896_vm8, %v3888_v37  ;;  %v826_v43 = vmax.f32 %v724_v33, 0.0 }
 0x188   :  { %v729_v38 = vpop.f32.mrb[22].mxu0  ;;  %1018 = vmatmul.mubr.f32.gmra.mrb[8].mxu1 %v3886_v30  ;;  %v827_v36 = vmax.f32 %v726_v35, 0.0 }
 0x189   :  { %v730_v15 = vadd.f32 %v729_v38, %v3772_v40  ;;  %v731_v39 = vpop.f32.mrb[23].mxu0 }
 0x18a   :  { %v732_v41 = vadd.f32 %v731_v39, %v3774_v54 }
 0x18b   :  { %v828_v44 = vmax.f32 %v730_v15, 0.0 }
 0x18c   :  { %v829_v10 = vmax.f32 %v732_v41, 0.0 }
 0x18d   :  { %v3897_v25 = vmax.f32 %v826_v43, %v828_v44 }
 0x18e   :  { %v3899_v53 = vmax.f32 %v827_v36, %v829_v10 }
 0x18f   :  { %v735_v45 = vpop.f32.mrb[24].mxu0 }
 0x190   :  { %v737_v47 = vpop.f32.mrb[25].mxu0  ;;  %2209 = vmatprep.mubr.msk.f32.mxu1 %vm896_vm8, %v3899_v53  ;;  %v736_v28 = vadd.f32 %v735_v45, %v3772_v40 }
 0x191   :  { %1023 = vmatmul.mubr.f32.gmra.mrb[10].mxu1 %v3897_v25  ;;  %v738_v49 = vadd.f32 %v737_v47, %v3774_v54 }
 0x192   :  { %v830_v58 = vmax.f32 %v736_v28, 0.0 }
 0x193   :  { %v741_v51 = vpop.f32.mrb[26].mxu0  ;;  %v831_v8 = vmax.f32 %v738_v49, 0.0 }
 0x194   :  { %v742_v52 = vadd.f32 %v741_v51, %v3772_v40  ;;  %v743_v55 = vpop.f32.mrb[27].mxu0 }
 0x195   :  { %v744_v56 = vadd.f32 %v743_v55, %v3774_v54 }
 0x196   :  { %v832_v31 = vmax.f32 %v742_v52, 0.0 }
 0x197   :  { %v833_v59 = vmax.f32 %v744_v56, 0.0 }
 0x198   :  { %v3908_v60 = vmax.f32 %v830_v58, %v832_v31  ;;  %v747_v61 = vpop.f32.mrb[28].mxu0 }
 0x199   :  { %v3910_v17 = vmax.f32 %v831_v8, %v833_v59  ;;  %v749_v62 = vpop.f32.mrb[29].mxu0  ;;  %v748_v63 = vadd.f32 %v747_v61, %v3772_v40 }
 0x19a   :  { %v750_v27 = vadd.f32 %v749_v62, %v3774_v54 }
 0x19b   :  { %2210 = vmatprep.mubr.msk.f32.mxu1 %vm896_vm8, %v3910_v17  ;;  %v834_v9 = vmax.f32 %v748_v63, 0.0 }
 0x19c   :  { %v753_v32 = vpop.f32.mrb[30].mxu0  ;;  %1028 = vmatmul.mubr.f32.gmra.mrb[12].mxu1 %v3908_v60  ;;  %v835_v12 = vmax.f32 %v750_v27, 0.0 }
 0x19d   :  { %v754_v0 = vadd.f32 %v753_v32, %v3772_v40  ;;  %v755_v4 = vpop.f32.mrb[31].mxu0 }
 0x19e   :  { %v756_v7 = vadd.f32 %v755_v4, %v3774_v54 }
 0x19f   :  { %v836_v11 = vmax.f32 %v754_v0, 0.0 }
 0x1a0   :  { %v837_v13 = vmax.f32 %v756_v7, 0.0 }
 0x1a1   :  { %v3919_v14 = vmax.f32 %v834_v9, %v836_v11 }
 0x1a2   :  { %v3921_v42 = vmax.f32 %v835_v12, %v837_v13 }
 0x1a3   :  { %v759_v16 = vpop.f32.mrb[32].mxu0 }
 0x1a4   :  { %v761_v18 = vpop.f32.mrb[33].mxu0  ;;  %2211 = vmatprep.mubr.msk.f32.mxu1 %vm896_vm8, %v3921_v42  ;;  %v760_v21 = vadd.f32 %v759_v16, %v3772_v40 }
 0x1a5   :  { %1033 = vmatmul.mubr.f32.gmra.mrb[14].mxu1 %v3919_v14  ;;  %v762_v57 = vadd.f32 %v761_v18, %v3774_v54 }
 0x1a6   :  { %v838_v29 = vmax.f32 %v760_v21, 0.0 }
 0x1a7   :  { %v765_v23 = vpop.f32.mrb[34].mxu0  ;;  %v839_v1 = vmax.f32 %v762_v57, 0.0 }
 0x1a8   :  { %v766_v19 = vadd.f32 %v765_v23, %v3772_v40  ;;  %v767_v22 = vpop.f32.mrb[35].mxu0 }
 0x1a9   :  { %v768_v34 = vadd.f32 %v767_v22, %v3774_v54 }
 0x1aa   :  { %v840_v2 = vmax.f32 %v766_v19, 0.0 }
 0x1ab   :  { %v841_v33 = vmax.f32 %v768_v34, 0.0 }
 0x1ac   :  { %v3930_v35 = vmax.f32 %v838_v29, %v840_v2  ;;  %v771_v38 = vpop.f32.mrb[36].mxu0 }
 0x1ad   :  { %v3932_v15 = vmax.f32 %v839_v1, %v841_v33  ;;  %v773_v39 = vpop.f32.mrb[37].mxu0  ;;  %v772_v41 = vadd.f32 %v771_v38, %v3772_v40  ;;  %v1357_v33 = vld [vmem:[%s4572_s5 + $0x10] sm:$0xff]  ;;  %v1358_v38 = vld [vmem:[%s4572_s5 + $0x18] sm:$0xff] }
 0x1ae   :  { %v774_v43 = vadd.f32 %v773_v39, %v3774_v54  ;;  %v1375_v39 = vld [vmem:[%s4572_s5 + $0xa0] sm:$0xff] }
 0x1af   :  { %2212 = vmatprep.mubr.msk.f32.mxu1 %vm896_vm8, %v3932_v15  ;;  %v842_v47 = vmax.f32 %v772_v41, 0.0  ;;  %v1376_v41 = vld [vmem:[%s4572_s5 + $0xa8] sm:$0xff] }
 0x1b0   :  { %v777_v44 = vpop.f32.mrb[38].mxu0  ;;  %1038 = vmatmul.mubr.f32.gmra.mrb[16].mxu1 %v3930_v35  ;;  %v843_v49 = vmax.f32 %v774_v43, 0.0  ;;  %v1359_v43 = vld [vmem:[%s4572_s5 + $0x20] sm:$0xff] }
 0x1b1   :  { %v778_v36 = vadd.f32 %v777_v44, %v3772_v40  ;;  %v779_v10 = vpop.f32.mrb[39].mxu0  ;;  %v2695_v44 = vpack.c.bf16 %v1376_v41, %v1375_v39  ;;  %v1385_v41 = vld [vmem:[%s4572_s5 + $0xf0] sm:$0xff] }
 0x1b2   :  { %v780_v45 = vadd.f32 %v779_v10, %v3774_v54  ;;  %v1377_v10 = vld [vmem:[%s4572_s5 + $0xb0] sm:$0xff] }
 0x1b3   :  { %v844_v28 = vmax.f32 %v778_v36, 0.0  ;;  %v1360_v36 = vld [vmem:[%s4572_s5 + $0x28] sm:$0xff] }
 0x1b4   :  { %v845_v51 = vmax.f32 %v780_v45, 0.0  ;;  %v1378_v45 = vld [vmem:[%s4572_s5 + $0xb8] sm:$0xff] }
 0x1b5   :  { %v872_v52 = vmax.f32 %v842_v47, %v844_v28  ;;  %v2697_v28 = vpack.c.bf16 %v1360_v36, %v1359_v43  ;;  %v1386_v43 = vld [vmem:[%s4572_s5 + $0xf8] sm:$0xff]  ;;  %v1369_v36 = vld [vmem:[%s4572_s5 + $0x70] sm:$0xff] }
 0x1b6   :  { %v873_v55 = vmax.f32 %v843_v49, %v845_v51  ;;  %v2699_v49 = vpack.c.bf16 %v1378_v45, %v1377_v10  ;;  %v1361_v51 = vld [vmem:[%s4572_s5 + $0x30] sm:$0xff]  ;;  %v1370_v10 = vld [vmem:[%s4572_s5 + $0x78] sm:$0xff] }
 0x1b7   :  { %v783_v56 = vpop.f32.mrb[40].mxu0 }
 0x1b8   :  { %v785_v58 = vpop.f32.mrb[41].mxu0  ;;  %2213 = vmatprep.mubr.msk.f32.mxu1 %vm896_vm8, %v873_v55  ;;  %v784_v31 = vadd.f32 %v783_v56, %v3772_v40 }
 0x1b9   :  { %1043 = vmatmul.mubr.f32.gmra.mrb[18].mxu1 %v872_v52  ;;  %v786_v8 = vadd.f32 %v785_v58, %v3774_v54  ;;  %v1380_v58 = vld [vmem:[%s4572_s5 + $0xc8] sm:$0xff] }
 0x1ba   :  { %v846_v27 = vmax.f32 %v784_v31, 0.0 }
 0x1bb   :  { %v789_v59 = vpop.f32.mrb[42].mxu0  ;;  %v847_v0 = vmax.f32 %v786_v8, 0.0  ;;  %v1363_v8 = vld [vmem:[%s4572_s5 + $0x40] sm:$0xff] }
 0x1bc   :  { %v790_v61 = vadd.f32 %v789_v59, %v3772_v40  ;;  %v791_v62 = vpop.f32.mrb[43].mxu0 }
 0x1bd   :  { %v792_v63 = vadd.f32 %v791_v62, %v3774_v54  ;;  %v1387_v62 = vld [vmem:[%s4572_s5 + $0x100] sm:$0xff] }
 0x1be   :  { %v848_v32 = vmax.f32 %v790_v61, 0.0  ;;  %v1364_v61 = vld [vmem:[%s4572_s5 + $0x48] sm:$0xff] }
 0x1bf   :  { %v849_v4 = vmax.f32 %v792_v63, 0.0  ;;  %v1388_v63 = vld [vmem:[%s4572_s5 + $0x108] sm:$0xff] }
 0x1c0   :  { %v874_v7 = vmax.f32 %v846_v27, %v848_v32  ;;  %v795_v9 = vpop.f32.mrb[44].mxu0  ;;  %v1381_v27 = vld [vmem:[%s4572_s5 + $0xd0] sm:$0xff]  ;;  %v1382_v32 = vld [vmem:[%s4572_s5 + $0xd8] sm:$0xff] }
 0x1c1   :  { %v875_v11 = vmax.f32 %v847_v0, %v849_v4  ;;  %v797_v12 = vpop.f32.mrb[45].mxu0  ;;  %v796_v13 = vadd.f32 %v795_v9, %v3772_v40  ;;  %v2719_v0 = vpack.c.bf16 %v1388_v63, %v1387_v62  ;;  %v1389_v4 = vld [vmem:[%s4572_s5 + $0x110] sm:$0xff]  ;;  %v2705_v9 = vpack.c.bf16 %v1364_v61, %v1363_v8  ;;  %v1398_v8 = vld [vmem:[%s4572_s5 + $0x158] sm:$0xff] }
 0x1c2   :  { %v798_v16 = vadd.f32 %v797_v12, %v3774_v54  ;;  %v1391_v12 = vld [vmem:[%s4572_s5 + $0x120] sm:$0xff] }
 0x1c3   :  { %2214 = vmatprep.mubr.msk.f32.mxu1 %vm896_vm8, %v875_v11  ;;  %v850_v19 = vmax.f32 %v796_v13, 0.0  ;;  %2720 = vmatprep.subr.bf16.mxu1 %v2719_v0  ;;  %v1392_v13 = vld [vmem:[%s4572_s5 + $0x128] sm:$0xff] }
 0x1c4   :  { %1048 = vmatmul.mubr.f32.gmra.mrb[20].mxu1 %v874_v7  ;;  %v851_v34 = vmax.f32 %v798_v16, 0.0  ;;  %v2707_v16 = vpack.c.bf16 %v1382_v32, %v1381_v27 }
 0x1c5   :  { %v801_v18 = vpop.f32.mrb[46].mxu0 }
 0x1c6   :  { %v802_v21 = vadd.f32 %v801_v18, %v3772_v40  ;;  %v803_v57 = vpop.f32.mrb[47].mxu0  ;;  %v1365_v18 = vld [vmem:[%s4572_s5 + $0x50] sm:$0xff] }
 0x1c7   :  { %v804_v23 = vadd.f32 %v803_v57, %v3774_v54  ;;  %v1383_v57 = vld [vmem:[%s4572_s5 + $0xe0] sm:$0xff] }
 0x1c8   :  { %v852_v22 = vmax.f32 %v802_v21, 0.0  ;;  %v1366_v21 = vld [vmem:[%s4572_s5 + $0x58] sm:$0xff] }
 0x1c9   :  { %v853_v29 = vmax.f32 %v804_v23, 0.0  ;;  %v1384_v23 = vld [vmem:[%s4572_s5 + $0xe8] sm:$0xff] }
 0x1ca   :  { %v876_v2 = vmax.f32 %v850_v19, %v852_v22  ;;  %v2727_v19 = vpack.c.bf16 %v1392_v13, %v1391_v12  ;;  %v2709_v22 = vpack.c.bf16 %v1366_v21, %v1365_v18 }
 0x1cb   :  { %v877_v1 = vmax.f32 %v851_v34, %v853_v29  ;;  %v2711_v29 = vpack.c.bf16 %v1384_v23, %v1383_v57 }
 0x1cd   :  { %2215 = vmatprep.mubr.msk.f32.mxu1 %vm896_vm8, %v877_v1 }
 0x1ce   :  { %1053 = vmatmul.mubr.f32.gmra.mrb[22].mxu1 %v876_v2 }
 0x1cf   :  { %2216 = vmatprep.mubr.msk.f32.mxu1 %vm896_vm8, %v3788_v3 }
 0x1d2   :  { %1141 = vmatmul.mubr.f32.vlgmr.msra.gmra.mrb[24].mxu1 %v3786_v20 }
 0x1d3   :  { %2217 = vmatprep.mubr.msk.f32.mxu1 %vm896_vm8, %v3812_v26  ;;  %2722 = vmatpush3.bf16.msra.mxu1 %v2719_v0 }
 0x1d6   :  { %1146 = vmatmul.mubr.f32.gmra.mrb[26].mxu1 %v3810_v24 }
 0x1d7   :  { %2218 = vmatprep.mubr.msk.f32.mxu1 %vm896_vm8, %v3844_v50 }
 0x1da   :  { %1151 = vmatmul.mubr.f32.gmra.mrb[28].mxu1 %v3842_v48 }
 0x1db   :  { %2219 = vmatprep.mubr.msk.f32.mxu1 %vm896_vm8, %v3869_v6  ;;  %v1372_v6 = vld [vmem:[%s4572_s5 + $0x88] sm:$0xff] }
 0x1de   :  { %1156 = vmatmul.mubr.f32.gmra.mrb[30].mxu1 %v3867_v5  ;;  %v1371_v5 = vld [vmem:[%s4572_s5 + $0x80] sm:$0xff] }
 0x1df   :  { %2220 = vmatprep.mubr.msk.f32.mxu1 %vm896_vm8, %v3888_v37  ;;  %v2687_v37 = vpack.c.bf16 %v1372_v6, %v1371_v5 }
 0x1e1   :  { %2688 = vmatprep.subr.bf16.mxu0 %v2687_v37 }
 0x1e2   :  { %1161 = vmatmul.mubr.f32.gmra.mrb[32].mxu1 %v3886_v30  ;;  %v1355_v30 = vld [vmem:[%s4572_s5] sm:$0xff] }
 0x1e3   :  { %2221 = vmatprep.mubr.msk.f32.mxu1 %vm896_vm8, %v3899_v53 }
 0x1e6   :  { %1166 = vmatmul.mubr.f32.gmra.mrb[34].mxu1 %v3897_v25  ;;  %v1356_v25 = vld [vmem:[%s4572_s5 + $0x8] sm:$0xff] }
 0x1e7   :  { %2222 = vmatprep.mubr.msk.f32.mxu1 %vm896_vm8, %v3910_v17  ;;  %v2689_v53 = vpack.c.bf16 %v1356_v25, %v1355_v30 }
 0x1e9   :  { %2690 = vmatpush3.bf16.msra.mxu0 %v2689_v53 }
 0x1ea   :  { %1171 = vmatmul.mubr.f32.gmra.mrb[36].mxu1 %v3908_v60 }
 0x1eb   :  { %2223 = vmatprep.mubr.msk.f32.mxu1 %vm896_vm8, %v3921_v42  ;;  %v1374_v42 = vld [vmem:[%s4572_s5 + $0x98] sm:$0xff] }
 0x1ee   :  { %1176 = vmatmul.mubr.f32.gmra.mrb[38].mxu1 %v3919_v14  ;;  %v1373_v14 = vld [vmem:[%s4572_s5 + $0x90] sm:$0xff] }
 0x1ef   :  { %2224 = vmatprep.mubr.msk.f32.mxu1 %vm896_vm8, %v3932_v15  ;;  %v2693_v15 = vpack.c.bf16 %v1358_v38, %v1357_v33  ;;  %v1393_v33 = vld [vmem:[%s4572_s5 + $0x130] sm:$0xff] }
 0x1f2   :  { %1181 = vmatmul.mubr.f32.gmra.mrb[40].mxu1 %v3930_v35  ;;  %v2691_v35 = vpack.c.bf16 %v1374_v42, %v1373_v14 }
 0x1f3   :  { %2225 = vmatprep.mubr.msk.f32.mxu1 %vm896_vm8, %v873_v55  ;;  %v1379_v55 = vld [vmem:[%s4572_s5 + $0xc0] sm:$0xff] }
 0x1f4   :  { %2692 = vmatprep.subr.bf16.mxu0 %v2691_v35  ;;  %v2703_v59 = vpack.c.bf16 %v1380_v58, %v1379_v55  ;;  %v1394_v35 = vld [vmem:[%s4572_s5 + $0x138] sm:$0xff] }
 0x1f5   :  { %2694 = vmatpush3.bf16.msra.mxu0 %v2693_v15  ;;  %v2731_v39 = vpack.c.bf16 %v1394_v35, %v1393_v33  ;;  %v1655_v33 = vld [vmem:[%s4573_s7 + $0x8] sm:$0xff] }
 0x1f6   :  { %1186 = vmatmul.mubr.f32.gmra.mrb[42].mxu1 %v872_v52  ;;  %v1362_v52 = vld [vmem:[%s4572_s5 + $0x38] sm:$0xff]  ;;  %2696 = vmatprep.subr.bf16.mxu0 %v2695_v44  ;;  %v2715_v44 = vpack.c.bf16 %v1386_v43, %v1385_v41 }
 0x1f7   :  { %2226 = vmatprep.mubr.msk.f32.mxu1 %vm896_vm8, %v875_v11  ;;  %v2701_v31 = vpack.c.bf16 %v1362_v52, %v1361_v51  ;;  %v1396_v51 = vld [vmem:[%s4572_s5 + $0x148] sm:$0xff] }
 0x1f9   :  { %2698 = vmatpush3.bf16.msra.mxu0 %v2697_v28  ;;  %v2717_v28 = vpack.c.bf16 %v1370_v10, %v1369_v36 }
 0x1fa   :  { %1191 = vmatmul.mubr.f32.gmra.mrb[44].mxu1 %v874_v7  ;;  %2700 = vmatprep.subr.bf16.mxu0 %v2699_v49  ;;  %v1390_v7 = vld [vmem:[%s4572_s5 + $0x118] sm:$0xff]  ;;  %v1395_v49 = vld [vmem:[%s4572_s5 + $0x140] sm:$0xff] }
 0x1fb   :  { %2227 = vmatprep.mubr.msk.f32.mxu1 %vm896_vm8, %v877_v1  ;;  %v2723_v11 = vpack.c.bf16 %v1390_v7, %v1389_v4  ;;  %v1368_v1 = vld [vmem:[%s4572_s5 + $0x68] sm:$0xff] }
 0x1fd   :  { %2702 = vmatpush3.bf16.msra.mxu0 %v2701_v31  ;;  %2724 = vmatprep.subr.bf16.mxu1 %v2723_v11  ;;  %v1397_v31 = vld [vmem:[%s4572_s5 + $0x150] sm:$0xff] }
 0x1fe   :  { %1196 = vmatmul.mubr.f32.gmra.mrb[46].mxu1 %v876_v2  ;;  %2704 = vmatprep.subr.bf16.mxu0 %v2703_v59  ;;  %v1367_v2 = vld [vmem:[%s4572_s5 + $0x60] sm:$0xff]  ;;  %v2739_v61 = vpack.c.bf16 %v1398_v8, %v1397_v31 }
 0x1ff   :  { %2726 = vmatpush3.bf16.msra.mxu1 %v2723_v11 }
 0x200   :  { %2728 = vmatprep.subr.bf16.mxu1 %v2727_v19 }
 0x201   :  { %2706 = vmatpush3.bf16.msra.mxu0 %v2705_v9 }
 0x202   :  { %2708 = vmatprep.subr.bf16.mxu0 %v2707_v16 }
 0x203   :  { %2730 = vmatpush3.bf16.msra.mxu1 %v2727_v19 }
 0x204   :  { %2732 = vmatprep.subr.bf16.mxu1 %v2731_v39 }
 0x205   :  { %2710 = vmatpush3.bf16.msra.mxu0 %v2709_v22 }
 0x206   :  { %2712 = vmatprep.subr.bf16.mxu0 %v2711_v29 }
 0x207   :  { %2734 = vmatpush3.bf16.msra.mxu1 %v2731_v39 }
 0x234   :  { %v3982_v40 = vpop.f32.mrb[0].mxu1 }
 0x235   :  { %v1001_v54 = vpop.f32.mrb[1].mxu1 }
 0x23c   :  { %v3984_v20 = vpop.f32.mrb[2].mxu1 }
 0x23d   :  { %v1006_v3 = vpop.f32.mrb[3].mxu1 }
 0x23e   :  { %v2713_v3 = vpack.c.bf16 %v1368_v1, %v1367_v2 }
 0x240   :  { %2714 = vmatpush3.bf16.msra.mxu0 %v2713_v3 }
 0x241   :  { %2716 = vmatprep.subr.bf16.mxu0 %v2715_v44 }
 0x244   :  { %2718 = vmatpush3.bf16.msra.mxu0 %v2717_v28 }
 0x247   :  { %v3986_v24 = vpop.f32.mrb[4].mxu1 }
 0x248   :  { %v1011_v26 = vpop.f32.mrb[5].mxu1 }
 0x250   :  { %v3988_v48 = vpop.f32.mrb[6].mxu1 }
 0x251   :  { %v1016_v50 = vpop.f32.mrb[7].mxu1 }
 0x25b   :  { %v4002_v60 = vpop.f32.mrb[8].mxu1 }
 0x25c   :  { %v1021_v17 = vpop.f32.mrb[9].mxu1 }
 0x264   :  { %v4034_v47 = vpop.f32.mrb[10].mxu1 }
 0x265   :  { %v1026_v56 = vpop.f32.mrb[11].mxu1 }
 0x266   :  { %v2735_v56 = vpack.c.bf16 %v1396_v51, %v1395_v49 }
 0x268   :  { %2736 = vmatprep.subr.bf16.mxu1 %v2735_v56 }
 0x269   :  { %2738 = vmatpush3.bf16.msra.mxu1 %v2735_v56 }
 0x26a   :  { %2740 = vmatprep.subr.bf16.mxu1 %v2739_v61 }
 0x26d   :  { %2742 = vmatpush3.bf16.msra.mxu1 %v2739_v61 }
 0x26f   :  { %v4090_v34 = vpop.f32.mrb[12].mxu1 }
 0x270   :  { %v1031_v54 = vpop.f32.mrb[13].mxu1 }
 0x278   :  { %v4098_v26 = vpop.f32.mrb[14].mxu1 }
 0x279   :  { %v1036_v50 = vpop.f32.mrb[15].mxu1 }
 0x283   :  { %v4100_v5 = vpop.f32.mrb[16].mxu1 }
 0x284   :  { %v1041_v6 = vpop.f32.mrb[17].mxu1 }
 0x28c   :  { %v4102_v30 = vpop.f32.mrb[18].mxu1 }
 0x28d   :  { %v1046_v37 = vpop.f32.mrb[19].mxu1 }
 0x297   :  { %v4104_v25 = vpop.f32.mrb[20].mxu1 }
 0x298   :  { %v1051_v53 = vpop.f32.mrb[21].mxu1 }
 0x2a1   :  { %v4106_v17 = vpop.f32.mrb[22].mxu1 }
 0x2a2   :  { %v1056_v14 = vpop.f32.mrb[23].mxu1 }
 0x2a5   :  { %v4108_v42 = vpop.f32.mrb[24].mxu1 }
 0x2a6   :  { %v1201_v38 = vmax.f32 %v3982_v40, %v4108_v42  ;;  %v1144_v15 = vpop.f32.mrb[25].mxu1 }
 0x2a7   :  { %v1756_v15 = vld [vmem:[%s4574_s8 + $0x8] sm:$0xff] }
 0x2a9   :  { %v1147_v45 = vpop.f32.mrb[26].mxu1 }
 0x2aa   :  { %v4137_v52 = vmax.f32 %v3984_v20, %v1147_v45  ;;  %v1149_v55 = vpop.f32.mrb[27].mxu1 }
 0x2ad   :  { %v1152_v58 = vpop.f32.mrb[28].mxu1 }
 0x2ae   :  { %v4146_v59 = vmax.f32 %v3986_v24, %v1152_v58  ;;  %v1154_v20 = vpop.f32.mrb[29].mxu1  ;;  %v1399_v24 = vld [vmem:[%s4572_s5 + $0x160] sm:$0xff]  ;;  %s3112_s5 = smov 32  }
 0x2af   :  { %2447 = vmatprep.subr.mxu1 %v1399_v24 }
 0x2b0   :  { %v3058_v62 = vpack.i.bf16 %v4146_v59, %v4137_v52  ;;  %2448 = vmatpush3.msra.mxu1 %v1399_v24 }
 0x2b1   :  { %v1157_v63 = vpop.f32.mrb[30].mxu1 }
 0x2b2   :  { %v4151_v27 = vmax.f32 %v3988_v48, %v1157_v63  ;;  %3059 = vrot.lane.b32.xlu0 %v3058_v62, %s3109_s29  ;;  %v1159_v32 = vpop.f32.mrb[31].mxu1 }
 0x2b4   :  { %v3063_v0 = vpack.i.bf16 %v4151_v27, %v4146_v59 }
 0x2b5   :  { %v1162_v4 = vpop.f32.mrb[32].mxu1 }
 0x2b6   :  { %v4160_v7 = vmax.f32 %v4002_v60, %v1162_v4  ;;  %1271 = vrot.lane.b32.xlu0 %v4151_v27, %s3110_s18  ;;  %3064 = vrot.lane.b32.xlu1 %v3063_v0, %s3111_s19  ;;  %v1164_v48 = vpop.f32.mrb[33].mxu1 }
 0x2b8   :  { %v3068_v9 = vpack.i.bf16 %v4160_v7, %v4151_v27 }
 0x2b9   :  { %v1167_v11 = vpop.f32.mrb[34].mxu1 }
 0x2ba   :  { %v4168_v12 = vmax.f32 %v4034_v47, %v1167_v11  ;;  %3069 = vrot.lane.b32.xlu0 %v3068_v9, %s3109_s29  ;;  %1273 = vrot.lane.b32.xlu1 %v4160_v7, %s3110_s18  ;;  %v1169_v60 = vpop.f32.mrb[35].mxu1 }
 0x2bc   :  { %v3073_v13 = vpack.i.bf16 %v4168_v12, %v4160_v7 }
 0x2bd   :  { %v1172_v16 = vpop.f32.mrb[36].mxu1 }
 0x2be   :  { %v4176_v18 = vmax.f32 %v4090_v34, %v1172_v16  ;;  %1296 = vrot.lane.b32.xlu0 %v4160_v7, %s3112_s5  ;;  %3074 = vrot.lane.b32.xlu1 %v3073_v13, %s3111_s19  ;;  %v1174_v47 = vpop.f32.mrb[37].mxu1 }
 0x2c0   :  { %v3078_v19 = vpack.i.bf16 %v4176_v18, %v4168_v12 }
 0x2c1   :  { %v1177_v21 = vpop.f32.mrb[38].mxu1 }
 0x2c2   :  { %v4182_v57 = vmax.f32 %v4098_v26, %v1177_v21  ;;  %1275 = vrot.lane.b32.xlu0 %v4168_v12, %s3110_s18  ;;  %1298 = vrot.lane.b32.xlu1 %v4168_v12, %s3112_s5  ;;  %v1179_v23 = vpop.f32.mrb[39].mxu1 }
 0x2c4   :  { %v3083_v3 = vpack.i.bf16 %v4182_v57, %v4176_v18 }
 0x2c5   :  { %v1182_v22 = vpop.f32.mrb[40].mxu1 }
 0x2c6   :  { %v1209_v34 = vmax.f32 %v4100_v5, %v1182_v22  ;;  %3079 = vrot.lane.b32.xlu0 %v3078_v19, %s3109_s29  ;;  %1277 = vrot.lane.b32.xlu1 %v4176_v18, %s3110_s18  ;;  %v1184_v29 = vpop.f32.mrb[41].mxu1 }
 0x2c9   :  { %v1187_v2 = vpop.f32.mrb[42].mxu1 }
 0x2ca   :  { %v1210_v1 = vmax.f32 %v4102_v30, %v1187_v2  ;;  %1300 = vrot.lane.b32.xlu1 %v4176_v18, %s3112_s5  ;;  %1279 = vrot.lane.b32.xlu0 %v4182_v57, %s3110_s18  ;;  %v1189_v54 = vpop.f32.mrb[43].mxu1  ;;  %v3088_v30 = vpack.i.bf16 %v1209_v34, %v4182_v57 }
 0x2cc   :  { %v3093_v26 = vpack.i.bf16 %v1210_v1, %v1209_v34 }
 0x2cd   :  { %v1192_v50 = vpop.f32.mrb[44].mxu1 }
 0x2ce   :  { %v1211_v5 = vmax.f32 %v4104_v25, %v1192_v50  ;;  %1302 = vrot.lane.b32.xlu0 %v4182_v57, %s3112_s5  ;;  %3084 = vrot.lane.b32.xlu1 %v3083_v3, %s3111_s19  ;;  %v1194_v6 = vpop.f32.mrb[45].mxu1  ;;  %v1654_v25 = vld [vmem:[%s4573_s7] sm:$0xff] }
 0x2cf   :  { %v2743_v35 = vpack.c.bf16 %v1655_v33, %v1654_v25 }
 0x2d1   :  { %v1197_v37 = vpop.f32.mrb[46].mxu1  ;;  %2744 = vmatprep.subr.bf16.mxu0 %v2743_v35 }
 0x2d2   :  { %v1212_v53 = vmax.f32 %v4106_v17, %v1197_v37  ;;  %3089 = vrot.lane.b32.xlu0 %v3088_v30, %s3109_s29  ;;  %1281 = vrot.lane.b32.xlu1 %v1209_v34, %s3110_s18  ;;  %v1199_v14 = vpop.f32.mrb[47].mxu1  ;;  %v1755_v17 = vld [vmem:[%s4574_s8] sm:$0xff] }
 0x2d3   :  { %v2775_v39 = vpack.c.bf16 %v1756_v15, %v1755_v17 }
 0x2d5   :  { %2776 = vmatprep.subr.bf16.mxu1 %v2775_v39 }
 0x2d6   :  { %1283 = vrot.lane.b32.xlu0 %v1210_v1, %s3110_s18  ;;  %3094 = vrot.lane.b32.xlu1 %v3093_v26, %s3111_s19 }
 0x2da   :  { %1304 = vrot.lane.b32.xlu0 %v1209_v34, %s3112_s5  ;;  %1285 = vrot.lane.b32.xlu1 %v1211_v5, %s3110_s18 }
 0x2de   :  { %1308 = vrot.lane.b32.xlu0 %v1211_v5, %s3112_s5  ;;  %1306 = vrot.lane.b32.xlu1 %v1210_v1, %s3112_s5 }
 0x2e2   :  { %1310 = vrot.lane.b32.xlu1 %v1212_v53, %s3112_s5 }
 0x324   :  { %v3060_v41 = vpop.permute.xlu0 %3059 }
 0x325   :  { %v3062_v36 = vunpack.i.h.bf16 %v3060_v41  ;;  %v3061_v10 = vunpack.i.l.bf16 %v3060_v41 }
 0x327   :  { %v1321_v31 = vsel %vm1320_vm10, %v1201_v38, %v3061_v10  ;;  %v1322_v24 = vsel %vm1320_vm10, %v4137_v52, %v3062_v36 }
 0x328   :  { %v1272_v43 = vpop.permute.xlu0 %1271  ;;  %v3065_v44 = vpop.permute.xlu1 %3064 }
 0x329   :  { %v3067_v45 = vunpack.i.h.bf16 %v3065_v44  ;;  %v3066_v28 = vunpack.i.l.bf16 %v3065_v44 }
 0x32b   :  { %v1329_v49 = vsel %vm896_vm8, %v3061_v10, %v3066_v28  ;;  %v1330_v51 = vsel %vm896_vm8, %v3062_v36, %v3067_v45 }
 0x32c   :  { %v3070_v55 = vpop.permute.xlu0 %3069  ;;  %v1274_v56 = vpop.permute.xlu1 %1273  ;;  %v1338_v58 = vsel %vm1337_vm9, %v1329_v49, %v1272_v43 }
 0x32d   :  { %1496 = vmatprep.mubr.f32.mxu0 %v1338_v58  ;;  %v1339_v8 = vsel %vm1337_vm9, %v1330_v51, %v1274_v56  ;;  %v3071_v62 = vunpack.i.l.bf16 %v3070_v55  ;;  %v3072_v9 = vunpack.i.h.bf16 %v3070_v55  ;;  %v1657_v58 = vld [vmem:[%s4573_s7 + $0x18] sm:$0xff] }
 0x32e   :  { %1497 = vmatmul.mubr.f32.vlgmr.msra.gmra.mrb[48].mxu0 %v1321_v31 }
 0x32f   :  { %1501 = vmatprep.mubr.f32.mxu0 %v1339_v8  ;;  %2746 = vmatpush3.bf16.msra.mxu0 %v2743_v35  ;;  %v1323_v11 = vsel %vm1320_vm10, %v4146_v59, %v3071_v62  ;;  %v1324_v47 = vsel %vm1320_vm10, %v4151_v27, %v3072_v9  ;;  %v1758_v8 = vld [vmem:[%s4574_s8 + $0x18] sm:$0xff] }
 0x330   :  { %v1297_v20 = vpop.permute.xlu0 %1296  ;;  %v3075_v61 = vpop.permute.xlu1 %3074 }
 0x331   :  { %v1347_v63 = vsel %vm1346_vm11, %v1272_v43, %v1297_v20  ;;  %v3076_v32 = vunpack.i.l.bf16 %v3075_v61  ;;  %v3077_v42 = vunpack.i.h.bf16 %v3075_v61  ;;  %v1658_v61 = vld [vmem:[%s4573_s7 + $0x20] sm:$0xff] }
 0x332   :  { %1502 = vmatmul.mubr.f32.gmra.mrb[50].mxu0 %v1322_v24  ;;  %2449 = vmatprep.mubr.msk.f32.mxu1 %vm1407_vm12, %v1347_v63  ;;  %v1759_v63 = vld [vmem:[%s4574_s8 + $0x20] sm:$0xff]  ;;  %v1760_v24 = vld [vmem:[%s4574_s8 + $0x28] sm:$0xff] }
 0x333   :  { %v1331_v40 = vsel %vm896_vm8, %v3071_v62, %v3076_v32  ;;  %v1332_v13 = vsel %vm896_vm8, %v3072_v9, %v3077_v42  ;;  %v1659_v62 = vld [vmem:[%s4573_s7 + $0x28] sm:$0xff]  ;;  %v1660_v42 = vld [vmem:[%s4573_s7 + $0x30] sm:$0xff] }
 0x334   :  { %v1276_v38 = vpop.permute.xlu0 %1275  ;;  %v1299_v0 = vpop.permute.xlu1 %1298  ;;  %v2751_v32 = vpack.c.bf16 %v1659_v62, %v1658_v61 }
 0x335   :  { %v1348_v4 = vsel %vm1346_vm11, %v1274_v56, %v1299_v0  ;;  %v1340_v48 = vsel %vm1337_vm9, %v1331_v40, %v1276_v38  ;;  %v1656_v56 = vld [vmem:[%s4573_s7 + $0x10] sm:$0xff]  ;;  %v2783_v40 = vpack.c.bf16 %v1760_v24, %v1759_v63 }
 0x336   :  { %1506 = vmatprep.mubr.f32.mxu0 %v1340_v48  ;;  %2450 = vmatmul.mubr.msk.f32.vlgmr.msra.gmra.mrb[48].mxu1 %vm1407_vm12, %v1348_v4  ;;  %v2747_v31 = vpack.c.bf16 %v1657_v58, %v1656_v56  ;;  %v1761_v0 = vld [vmem:[%s4574_s8 + $0x30] sm:$0xff]  ;;  %v1762_v48 = vld [vmem:[%s4574_s8 + $0x38] sm:$0xff] }
 0x337   :  { %1507 = vmatmul.mubr.f32.gmra.mrb[52].mxu0 %v1323_v11  ;;  %2778 = vmatpush3.bf16.msra.mxu1 %v2775_v39  ;;  %v2787_v9 = vpack.c.bf16 %v1762_v48, %v1761_v0  ;;  %v1662_v11 = vld [vmem:[%s4573_s7 + $0x40] sm:$0xff] }
 0x338   :  { %v3080_v52 = vpop.permute.xlu0 %3079  ;;  %v1278_v60 = vpop.permute.xlu1 %1277  ;;  %2748 = vmatprep.subr.bf16.mxu0 %v2747_v31 }
 0x339   :  { %v1341_v16 = vsel %vm1337_vm9, %v1332_v13, %v1278_v60  ;;  %v3082_v59 = vunpack.i.h.bf16 %v3080_v52  ;;  %v3081_v29 = vunpack.i.l.bf16 %v3080_v52  ;;  %2750 = vmatpush3.bf16.msra.mxu0 %v2747_v31  ;;  %v1663_v52 = vld [vmem:[%s4573_s7 + $0x48] sm:$0xff] }
 0x33a   :  { %1511 = vmatprep.mubr.f32.mxu0 %v1341_v16  ;;  %2752 = vmatprep.subr.bf16.mxu0 %v2751_v32  ;;  %v2759_v13 = vpack.c.bf16 %v1663_v52, %v1662_v11  ;;  %v1764_v16 = vld [vmem:[%s4574_s8 + $0x48] sm:$0xff] }
 0x33b   :  { %1512 = vmatmul.mubr.f32.gmra.mrb[54].mxu0 %v1324_v47  ;;  %v1325_v6 = vsel %vm1320_vm10, %v4160_v7, %v3081_v29  ;;  %v1326_v14 = vsel %vm1320_vm10, %v4168_v12, %v3082_v59 }
 0x33c   :  { %v1301_v21 = vpop.permute.xlu1 %1300  ;;  %v1280_v23 = vpop.permute.xlu0 %1279 }
 0x33d   :  { %v1349_v19 = vsel %vm1346_vm11, %v1276_v38, %v1301_v21  ;;  %2754 = vmatpush3.bf16.msra.mxu0 %v2751_v32  ;;  %v1661_v38 = vld [vmem:[%s4573_s7 + $0x38] sm:$0xff]  ;;  %v1664_v21 = vld [vmem:[%s4573_s7 + $0x50] sm:$0xff] }
 0x33e   :  { %2452 = vmatprep.mubr.msk.f32.mxu1 %vm1407_vm12, %v1349_v19  ;;  %v2755_v4 = vpack.c.bf16 %v1661_v38, %v1660_v42  ;;  %v1765_v19 = vld [vmem:[%s4574_s8 + $0x50] sm:$0xff] }
 0x340   :  { %v1303_v22 = vpop.permute.xlu0 %1302  ;;  %v3085_v34 = vpop.permute.xlu1 %3084  ;;  %2756 = vmatprep.subr.bf16.mxu0 %v2755_v4 }
 0x341   :  { %v1350_v2 = vsel %vm1346_vm11, %v1278_v60, %v1303_v22  ;;  %v3087_v1 = vunpack.i.h.bf16 %v3085_v34  ;;  %v3086_v54 = vunpack.i.l.bf16 %v3085_v34  ;;  %2758 = vmatpush3.bf16.msra.mxu0 %v2755_v4  ;;  %v1763_v60 = vld [vmem:[%s4574_s8 + $0x40] sm:$0xff]  ;;  %v1766_v22 = vld [vmem:[%s4574_s8 + $0x58] sm:$0xff] }
 0x342   :  { %2453 = vmatmul.mubr.msk.f32.gmra.mrb[50].mxu1 %vm1407_vm12, %v1350_v2  ;;  %v2791_v47 = vpack.c.bf16 %v1764_v16, %v1763_v60  ;;  %2760 = vmatprep.subr.bf16.mxu0 %v2759_v13  ;;  %v2795_v34 = vpack.c.bf16 %v1766_v22, %v1765_v19  ;;  %v1667_v2 = vld [vmem:[%s4573_s7 + $0x68] sm:$0xff] }
 0x343   :  { %v1333_v3 = vsel %vm896_vm8, %v3081_v29, %v3086_v54  ;;  %v1334_v27 = vsel %vm896_vm8, %v3082_v59, %v3087_v1  ;;  %v1666_v29 = vld [vmem:[%s4573_s7 + $0x60] sm:$0xff] }
 0x344   :  { %v3090_v26 = vpop.permute.xlu0 %3089  ;;  %v1282_v50 = vpop.permute.xlu1 %1281  ;;  %v1342_v5 = vsel %vm1337_vm9, %v1333_v3, %v1280_v23  ;;  %v1767_v1 = vld [vmem:[%s4574_s8 + $0x60] sm:$0xff]  ;;  %v2767_v54 = vpack.c.bf16 %v1667_v2, %v1666_v29  ;;  %v1768_v3 = vld [vmem:[%s4574_s8 + $0x68] sm:$0xff] }
 0x345   :  { %1516 = vmatprep.mubr.f32.mxu0 %v1342_v5  ;;  %v1343_v30 = vsel %vm1337_vm9, %v1334_v27, %v1282_v50  ;;  %v3092_v25 = vunpack.i.h.bf16 %v3090_v26  ;;  %v3091_v33 = vunpack.i.l.bf16 %v3090_v26  ;;  %2762 = vmatpush3.bf16.msra.mxu0 %v2759_v13  ;;  %v2799_v27 = vpack.c.bf16 %v1768_v3, %v1767_v1  ;;  %v1668_v26 = vld [vmem:[%s4573_s7 + $0x70] sm:$0xff] }
 0x346   :  { %1517 = vmatmul.mubr.f32.gmra.mrb[56].mxu0 %v1325_v6  ;;  %v1769_v5 = vld [vmem:[%s4574_s8 + $0x70] sm:$0xff] }
 0x347   :  { %1521 = vmatprep.mubr.f32.mxu0 %v1343_v30  ;;  %v1327_v36 = vsel %vm1320_vm10, %v4176_v18, %v3091_v33  ;;  %v1328_v51 = vsel %vm1320_vm10, %v4182_v57, %v3092_v25  ;;  %v1757_v57 = vld [vmem:[%s4574_s8 + $0x10] sm:$0xff]  ;;  %v1770_v30 = vld [vmem:[%s4574_s8 + $0x78] sm:$0xff] }
 0x348   :  { %v1284_v37 = vpop.permute.xlu0 %1283  ;;  %v3095_v53 = vpop.permute.xlu1 %3094  ;;  %v2779_v20 = vpack.c.bf16 %v1758_v8, %v1757_v57 }
 0x349   :  { %v3097_v17 = vunpack.i.h.bf16 %v3095_v53  ;;  %v3096_v35 = vunpack.i.l.bf16 %v3095_v53 }
 0x34a   :  { %1522 = vmatmul.mubr.f32.gmra.mrb[58].mxu0 %v1326_v14  ;;  %2780 = vmatprep.subr.bf16.mxu1 %v2779_v20 }
 0x34b   :  { %v1335_v15 = vsel %vm896_vm8, %v3091_v33, %v3096_v35  ;;  %v1336_v39 = vsel %vm896_vm8, %v3092_v25, %v3097_v17  ;;  %2782 = vmatpush3.bf16.msra.mxu1 %v2779_v20  ;;  %v2228_v35 = vld [vmem:[%s4575_s6] ss:$0 sm:$0xff] }
 0x34c   :  { %v1305_v41 = vpop.permute.xlu0 %1304  ;;  %v1286_v7 = vpop.permute.xlu1 %1285  ;;  %v1344_v43 = vsel %vm1337_vm9, %v1335_v15, %v1284_v37  ;;  %2784 = vmatprep.subr.bf16.mxu1 %v2783_v40 }
 0x34d   :  { %v1351_v44 = vsel %vm1346_vm11, %v1280_v23, %v1305_v41  ;;  %1526 = vmatprep.mubr.f32.mxu0 %v1344_v43  ;;  %v1345_v12 = vsel %vm1337_vm9, %v1336_v39, %v1286_v7  ;;  %v1665_v23 = vld [vmem:[%s4573_s7 + $0x58] sm:$0xff] }
 0x34e   :  { %1527 = vmatmul.mubr.f32.gmra.mrb[60].mxu0 %v1327_v36  ;;  %2455 = vmatprep.mubr.msk.f32.mxu1 %vm1407_vm12, %v1351_v44  ;;  %v2763_v59 = vpack.c.bf16 %v1665_v23, %v1664_v21 }
 0x34f   :  { %1531 = vmatprep.mubr.f32.mxu0 %v1345_v12  ;;  %2786 = vmatpush3.bf16.msra.mxu1 %v2783_v40 }
 0x350   :  { %v1309_v10 = vpop.permute.xlu0 %1308  ;;  %v1307_v45 = vpop.permute.xlu1 %1306  ;;  %2788 = vmatprep.subr.bf16.mxu1 %v2787_v9  ;;  %2764 = vmatprep.subr.bf16.mxu0 %v2763_v59 }
 0x351   :  { %v1353_v28 = vsel %vm1346_vm11, %v1284_v37, %v1309_v10  ;;  %v1352_v49 = vsel %vm1346_vm11, %v1282_v50, %v1307_v45  ;;  %2766 = vmatpush3.bf16.msra.mxu0 %v2763_v59  ;;  %v1669_v50 = vld [vmem:[%s4573_s7 + $0x78] sm:$0xff]  ;;  %v2803_v37 = vpack.c.bf16 %v1770_v30, %v1769_v5  ;;  %v1887_v30 = vld [vmem:[%s4576_s9 + $0x80] sm:$0xff] }
 0x352   :  { %1532 = vmatmul.mubr.f32.gmra.mrb[62].mxu0 %v1328_v51  ;;  %2456 = vmatmul.mubr.msk.f32.gmra.mrb[52].mxu1 %vm1407_vm12, %v1352_v49  ;;  %v2771_v6 = vpack.c.bf16 %v1669_v50, %v1668_v26 }
 0x353   :  { %2458 = vmatprep.mubr.msk.f32.mxu1 %vm1407_vm12, %v1353_v28  ;;  %2790 = vmatpush3.bf16.msra.mxu1 %v2787_v9 }
 0x354   :  { %v1311_v18 = vpop.permute.xlu1 %1310  ;;  %2792 = vmatprep.subr.bf16.mxu1 %v2791_v47  ;;  %2768 = vmatprep.subr.bf16.mxu0 %v2767_v54 }
 0x355   :  { %v1354_v55 = vsel %vm1346_vm11, %v1286_v7, %v1311_v18  ;;  %2770 = vmatpush3.bf16.msra.mxu0 %v2767_v54 }
 0x356   :  { %2459 = vmatmul.mubr.msk.f32.gmra.mrb[54].mxu1 %vm1407_vm12, %v1354_v55  ;;  %2772 = vmatprep.subr.bf16.mxu0 %v2771_v6 }
 0x357   :  { %2794 = vmatpush3.bf16.msra.mxu1 %v2791_v47 }
 0x358   :  { %2796 = vmatprep.subr.bf16.mxu1 %v2795_v34 }
 0x359   :  { %2774 = vmatpush3.bf16.msra.mxu0 %v2771_v6 }
 0x35b   :  { %2798 = vmatpush3.bf16.msra.mxu1 %v2795_v34 }
 0x35c   :  { %2800 = vmatprep.subr.bf16.mxu1 %v2799_v27 }
 0x35f   :  { %2802 = vmatpush3.bf16.msra.mxu1 %v2799_v27 }
 0x360   :  { %2804 = vmatprep.subr.bf16.mxu1 %v2803_v37 }
 0x363   :  { %2806 = vmatpush3.bf16.msra.mxu1 %v2803_v37  ;;  %v1888_v37 = vld [vmem:[%s4576_s9 + $0x88] sm:$0xff] }
 0x364   :  { %2839 = vmatprep.subr.bf16.mxu1 %v3108_v46 }
 0x401   :  { %v2275_v53 = vpop.f32.mrb[48].mxu0 }
 0x402   :  { %v2276_v14 = vpop.f32.mrb[49].mxu0 }
 0x403   :  { %v2277_v25 = vadd.f32 %v2276_v14, %v2275_v53  ;;  %v1871_v53 = vld [vmem:[%s4576_s9] sm:$0xff]  ;;  %v2807_v14 = vpack.c.bf16 %v1888_v37, %v1887_v30 }
 0x405   :  { %v2278_v33 = vpop.f32.mrb[50].mxu0  ;;  %v1499_v7 = vadd.f32 %v2277_v25, %v2228_v35  ;;  %v1872_v25 = vld [vmem:[%s4576_s9 + $0x8] sm:$0xff]  ;;  %2808 = vmatprep.subr.bf16.mxu0 %v2807_v14 }
 0x406   :  { %v2279_v17 = vpop.f32.mrb[51].mxu0  ;;  %v1986_v14 = vld [vmem:[%s4577_s11 + $0x28] sm:$0xff] }
 0x407   :  { %v2280_v15 = vadd.f32 %v2279_v17, %v2278_v33  ;;  %v1889_v33 = vld [vmem:[%s4576_s9 + $0x90] sm:$0xff]  ;;  %v1890_v17 = vld [vmem:[%s4576_s9 + $0x98] sm:$0xff] }
 0x409   :  { %v1504_v39 = vadd.f32 %v2280_v15, %v2228_v35  ;;  %v2451_v41 = vpop.f32.mrb[48].mxu1  ;;  %v2811_v15 = vpack.c.bf16 %v1890_v17, %v1889_v33 }
 0x40a   :  { %v2281_v43 = vpop.f32.mrb[52].mxu0  ;;  %v1603_v44 = vpop.f32.mrb[49].mxu1 }
 0x40b   :  { %v1609_v36 = vadd.f32 %v2451_v41, %v1504_v39  ;;  %v1604_v12 = vadd.f32 %v1603_v44, %v1499_v7  ;;  %v2282_v10 = vpop.f32.mrb[53].mxu0  ;;  %v1873_v39 = vld [vmem:[%s4576_s9 + $0x10] sm:$0xff]  ;;  %v1874_v41 = vld [vmem:[%s4576_s9 + $0x18] sm:$0xff]  ;;  %v1891_v7 = vld [vmem:[%s4576_s9 + $0xa0] sm:$0xff] }
 0x40c   :  { %v2283_v45 = vadd.f32 %v2282_v10, %v2281_v43  ;;  %v1892_v43 = vld [vmem:[%s4576_s9 + $0xa8] sm:$0xff]  ;;  %v2813_v44 = vpack.c.bf16 %v1874_v41, %v1873_v39  ;;  %v1989_v41 = vld [vmem:[%s4577_s11 + $0x40] sm:$0xff] }
 0x40d   :  { %v1643_v28 = vmax.f32 %v1609_v36, 0.0  ;;  %v1642_v49 = vmax.f32 %v1604_v12, 0.0  ;;  %v2815_v36 = vpack.c.bf16 %v1892_v43, %v1891_v7  ;;  %v1875_v12 = vld [vmem:[%s4576_s9 + $0x20] sm:$0xff]  ;;  %v1876_v10 = vld [vmem:[%s4576_s9 + $0x28] sm:$0xff] }
 0x40e   :  { %v2284_v51 = vpop.f32.mrb[54].mxu0  ;;  %v1509_v31 = vadd.f32 %v2283_v45, %v2228_v35  ;;  %v1893_v45 = vld [vmem:[%s4576_s9 + $0xb0] sm:$0xff]  ;;  %v1990_v7 = vld [vmem:[%s4577_s11 + $0x48] sm:$0xff] }
 0x40f   :  { %v1650_v18 = vmax.f32 %v1642_v49, %v1643_v28  ;;  %v2285_v55 = vpop.f32.mrb[55].mxu0  ;;  %v1894_v28 = vld [vmem:[%s4576_s9 + $0xb8] sm:$0xff]  ;;  %v2817_v49 = vpack.c.bf16 %v1876_v10, %v1875_v12  ;;  %v2852_v43 = vpack.c.bf16 %v1990_v7, %v1989_v41 }
 0x410   :  { %v2286_v56 = vadd.f32 %v2285_v55, %v2284_v51  ;;  %v2819_v51 = vpack.c.bf16 %v1894_v28, %v1893_v45  ;;  %v1878_v55 = vld [vmem:[%s4576_s9 + $0x38] sm:$0xff] }
 0x411   :  { %2493 = vmatprep.mubr.f32.mxu0 %v1650_v18  ;;  %2531 = vmatprep.mubr.f32.mxu1 %v1650_v18  ;;  %v1877_v18 = vld [vmem:[%s4576_s9 + $0x30] sm:$0xff] }
 0x412   :  { %v1514_v58 = vadd.f32 %v2286_v56, %v2228_v35  ;;  %v1895_v56 = vld [vmem:[%s4576_s9 + $0xc0] sm:$0xff] }
 0x415   :  { %v2454_v57 = vpop.f32.mrb[50].mxu1 }
 0x416   :  { %v1619_v8 = vadd.f32 %v2454_v57, %v1514_v58  ;;  %v1613_v20 = vpop.f32.mrb[51].mxu1  ;;  %v1896_v58 = vld [vmem:[%s4576_s9 + $0xc8] sm:$0xff]  ;;  %v2821_v57 = vpack.c.bf16 %v1878_v55, %v1877_v18  ;;  %v1993_v18 = vld [vmem:[%s4577_s11 + $0x60] sm:$0xff] }
 0x417   :  { %v1614_v61 = vadd.f32 %v1613_v20, %v1509_v31  ;;  %v2823_v31 = vpack.c.bf16 %v1896_v58, %v1895_v56  ;;  %v1880_v20 = vld [vmem:[%s4576_s9 + $0x48] sm:$0xff]  ;;  %v3114_v58 = vmov 0.0  }
 0x418   :  { %v1645_v62 = vmax.f32 %v1619_v8, 0.0  ;;  %v1879_v8 = vld [vmem:[%s4576_s9 + $0x40] sm:$0xff]  ;;  %v1994_v55 = vld [vmem:[%s4577_s11 + $0x68] sm:$0xff] }
 0x419   :  { %v1644_v63 = vmax.f32 %v1614_v61, 0.0  ;;  %v2287_v32 = vpop.f32.mrb[56].mxu0  ;;  %v1897_v61 = vld [vmem:[%s4576_s9 + $0xd0] sm:$0xff]  ;;  %v2858_v56 = vpack.c.bf16 %v1994_v55, %v1993_v18 }
 0x41a   :  { %v2288_v24 = vpop.f32.mrb[57].mxu0 }
 0x41b   :  { %v1651_v40 = vmax.f32 %v1644_v63, %v1645_v62  ;;  %v2289_v42 = vadd.f32 %v2288_v24, %v2287_v32  ;;  %v1898_v62 = vld [vmem:[%s4576_s9 + $0xd8] sm:$0xff]  ;;  %v2825_v63 = vpack.c.bf16 %v1880_v20, %v1879_v8  ;;  %v1881_v24 = vld [vmem:[%s4576_s9 + $0x50] sm:$0xff]  ;;  %v2237_v8 = vld [vmem:[%s4578_s10] ss:$0 sm:$0xff] }
 0x41c   :  { %v2827_v32 = vpack.c.bf16 %v1898_v62, %v1897_v61  ;;  %v2078_v62 = vld [vmem:[%s4579_s13] sm:$0xff] }
 0x41d   :  { %v2290_v38 = vpop.f32.mrb[58].mxu0  ;;  %2494 = vmatmul.mubr.f32.vlgmr.msra.gmra.mrb[64].mxu0 %v1651_v40  ;;  %2532 = vmatmul.mubr.f32.vlgmr.msra.gmra.mrb[56].mxu1 %v1651_v40  ;;  %v1519_v16 = vadd.f32 %v2289_v42, %v2228_v35  ;;  %v1882_v40 = vld [vmem:[%s4576_s9 + $0x58] sm:$0xff]  ;;  %v1899_v42 = vld [vmem:[%s4576_s9 + $0xe0] sm:$0xff] }
 0x41e   :  { %v2291_v0 = vpop.f32.mrb[59].mxu0 }
 0x41f   :  { %v2292_v4 = vadd.f32 %v2291_v0, %v2290_v38  ;;  %v1900_v38 = vld [vmem:[%s4576_s9 + $0xe8] sm:$0xff]  ;;  %v2829_v0 = vpack.c.bf16 %v1882_v40, %v1881_v24 }
 0x421   :  { %v2293_v48 = vpop.f32.mrb[60].mxu0  ;;  %v1524_v52 = vadd.f32 %v2292_v4, %v2228_v35  ;;  %v2831_v4 = vpack.c.bf16 %v1900_v38, %v1899_v42  ;;  %v2080_v42 = vld [vmem:[%s4579_s13 + $0x10] sm:$0xff]  ;;  %v2081_v38 = vld [vmem:[%s4579_s13 + $0x18] sm:$0xff] }
 0x422   :  { %v2294_v9 = vpop.f32.mrb[61].mxu0 }
 0x423   :  { %v2295_v11 = vadd.f32 %v2294_v9, %v2293_v48  ;;  %v1883_v48 = vld [vmem:[%s4576_s9 + $0x60] sm:$0xff]  ;;  %v1884_v9 = vld [vmem:[%s4576_s9 + $0x68] sm:$0xff] }
 0x425   :  { %v2296_v60 = vpop.f32.mrb[62].mxu0  ;;  %v2457_v13 = vpop.f32.mrb[52].mxu1  ;;  %v1529_v1 = vadd.f32 %v2295_v11, %v2228_v35  ;;  %v2833_v11 = vpack.c.bf16 %v1884_v9, %v1883_v48  ;;  %v2083_v48 = vld [vmem:[%s4579_s13 + $0x28] sm:$0xff] }
 0x426   :  { %v1629_v47 = vadd.f32 %v2457_v13, %v1524_v52  ;;  %v2297_v21 = vpop.f32.mrb[63].mxu0  ;;  %v1623_v23 = vpop.f32.mrb[53].mxu1 }
 0x427   :  { %v2298_v19 = vadd.f32 %v2297_v21, %v2296_v60  ;;  %v1624_v59 = vadd.f32 %v1623_v23, %v1519_v16  ;;  %v1901_v23 = vld [vmem:[%s4576_s9 + $0xf0] sm:$0xff] }
 0x428   :  { %v1647_v22 = vmax.f32 %v1629_v47, 0.0 }
 0x429   :  { %v1646_v34 = vmax.f32 %v1624_v59, 0.0  ;;  %v1534_v29 = vadd.f32 %v2298_v19, %v2228_v35  ;;  %v2460_v2 = vpop.f32.mrb[54].mxu1  ;;  %v2809_v35 = vpack.c.bf16 %v1872_v25, %v1871_v53  ;;  %v1902_v19 = vld [vmem:[%s4576_s9 + $0xf8] sm:$0xff]  ;;  %v1985_v53 = vld [vmem:[%s4577_s11 + $0x20] sm:$0xff] }
 0x42a   :  { %v1633_v54 = vpop.f32.mrb[55].mxu1  ;;  %v2835_v59 = vpack.c.bf16 %v1902_v19, %v1901_v23  ;;  %v2846_v17 = vpack.c.bf16 %v1986_v14, %v1985_v53 }
 0x42b   :  { %v1652_v3 = vmax.f32 %v1646_v34, %v1647_v22  ;;  %v1639_v27 = vadd.f32 %v2460_v2, %v1534_v29  ;;  %v1634_v26 = vadd.f32 %v1633_v54, %v1529_v1  ;;  %2810 = vmatpush3.bf16.msra.mxu0 %v2809_v35  ;;  %v1885_v22 = vld [vmem:[%s4576_s9 + $0x70] sm:$0xff]  ;;  %v1886_v34 = vld [vmem:[%s4576_s9 + $0x78] sm:$0xff]  ;;  %v1981_v2 = vld [vmem:[%s4577_s11] sm:$0xff] }
 0x42c   :  { %2812 = vmatprep.subr.bf16.mxu0 %v2811_v15  ;;  %v2837_v29 = vpack.c.bf16 %v1886_v34, %v1885_v22  ;;  %v1982_v1 = vld [vmem:[%s4577_s11 + $0x8] sm:$0xff]  ;;  %v1983_v54 = vld [vmem:[%s4577_s11 + $0x10] sm:$0xff]  ;;  %v1988_v15 = vld [vmem:[%s4577_s11 + $0x38] sm:$0xff] }
 0x42d   :  { %v1649_v50 = vmax.f32 %v1639_v27, 0.0  ;;  %v1648_v5 = vmax.f32 %v1634_v26, 0.0  ;;  %2496 = vmatprep.mubr.f32.mxu0 %v1652_v3  ;;  %2534 = vmatprep.mubr.f32.mxu1 %v1652_v3  ;;  %v2840_v3 = vpack.c.bf16 %v1982_v1, %v1981_v2  ;;  %v1984_v27 = vld [vmem:[%s4577_s11 + $0x18] sm:$0xff]  ;;  %v1987_v35 = vld [vmem:[%s4577_s11 + $0x30] sm:$0xff]  ;;  %v2240_v34 = vld [vmem:[%s4581_s14] ss:$0 sm:$0xff] }
 0x42e   :  { %v2849_v39 = vpack.c.bf16 %v1988_v15, %v1987_v35 }
 0x42f   :  { %v1653_v6 = vmax.f32 %v1648_v5, %v1649_v50  ;;  %2814 = vmatpush3.bf16.msra.mxu0 %v2813_v44  ;;  %2841 = vmatpush3.bf16.msra.mxu1 %v2840_v3  ;;  %v2843_v5 = vpack.c.bf16 %v1984_v27, %v1983_v54  ;;  %v1991_v44 = vld [vmem:[%s4577_s11 + $0x50] sm:$0xff] }
 0x430   :  { %2816 = vmatprep.subr.bf16.mxu0 %v2815_v36  ;;  %2842 = vmatprep.subr.bf16.mxu1 %v3108_v46  ;;  %v1992_v36 = vld [vmem:[%s4577_s11 + $0x58] sm:$0xff] }
 0x431   :  { %2497 = vmatmul.mubr.f32.gmra.mrb[66].mxu0 %v1653_v6  ;;  %2535 = vmatmul.mubr.f32.gmra.mrb[58].mxu1 %v1653_v6  ;;  %v2855_v12 = vpack.c.bf16 %v1992_v36, %v1991_v44 }
 0x432   :  { %2567 = vmatprep.mubr.msk.f32.mxu1 %vm3115_vm14, %v3114_v58 }
 0x433   :  { %2818 = vmatpush3.bf16.msra.mxu0 %v2817_v49  ;;  %2844 = vmatpush3.bf16.msra.mxu1 %v2843_v5 }
 0x434   :  { %2820 = vmatprep.subr.bf16.mxu0 %v2819_v51  ;;  %2845 = vmatprep.subr.bf16.mxu1 %v3108_v46 }
 0x437   :  { %2822 = vmatpush3.bf16.msra.mxu0 %v2821_v57  ;;  %2847 = vmatpush3.bf16.msra.mxu1 %v2846_v17  ;;  %v1995_v57 = vld [vmem:[%s4577_s11 + $0x70] sm:$0xff] }
 0x438   :  { %2824 = vmatprep.subr.bf16.mxu0 %v2823_v31  ;;  %2848 = vmatprep.subr.bf16.mxu1 %v3108_v46 }
 0x43b   :  { %2826 = vmatpush3.bf16.msra.mxu0 %v2825_v63  ;;  %2850 = vmatpush3.bf16.msra.mxu1 %v2849_v39  ;;  %v2079_v63 = vld [vmem:[%s4579_s13 + $0x8] sm:$0xff] }
 0x43c   :  { %2828 = vmatprep.subr.bf16.mxu0 %v2827_v32  ;;  %2851 = vmatprep.subr.bf16.mxu1 %v3108_v46  ;;  %v2861_v24 = vpack.c.bf16 %v2079_v63, %v2078_v62 }
 0x43f   :  { %2830 = vmatpush3.bf16.msra.mxu0 %v2829_v0  ;;  %2853 = vmatpush3.bf16.msra.mxu1 %v2852_v43  ;;  %v2864_v0 = vpack.c.bf16 %v2081_v38, %v2080_v42 }
 0x440   :  { %2832 = vmatprep.subr.bf16.mxu0 %v2831_v4  ;;  %2854 = vmatprep.subr.bf16.mxu1 %v3108_v46  ;;  %v2082_v4 = vld [vmem:[%s4579_s13 + $0x20] sm:$0xff] }
 0x441   :  { %v2867_v9 = vpack.c.bf16 %v2083_v48, %v2082_v4 }
 0x443   :  { %2834 = vmatpush3.bf16.msra.mxu0 %v2833_v11  ;;  %2856 = vmatpush3.bf16.msra.mxu1 %v2855_v12  ;;  %v2084_v11 = vld [vmem:[%s4579_s13 + $0x30] sm:$0xff] }
 0x444   :  { %2836 = vmatprep.subr.bf16.mxu0 %v2835_v59  ;;  %2857 = vmatprep.subr.bf16.mxu1 %v3108_v46 }
 0x447   :  { %2838 = vmatpush3.bf16.msra.mxu0 %v2837_v29  ;;  %2859 = vmatpush3.bf16.msra.mxu1 %v2858_v56 }
 0x448   :  { %2565 = vmatprep.subr.mxu1 %v3114_v58 }
 0x44b   :  { %2566 = vmatpush3.msra.mxu1 %v1995_v57 }
 0x44c   :  { %2860 = vmatprep.subr.bf16.mxu1 %v3108_v46 }
 0x4f0   :  { %v2495_v52 = vpop.f32.mrb[64].mxu0  ;;  %v2533_v60 = vpop.f32.mrb[56].mxu1 }
 0x4f1   :  { %v1857_v13 = vmax.f32 %v2495_v52, %v2533_v60  ;;  %v1736_v16 = vpop.f32.mrb[65].mxu0  ;;  %v1837_v47 = vpop.f32.mrb[57].mxu1  ;;  %v2085_v52 = vld [vmem:[%s4579_s13 + $0x38] sm:$0xff] }
 0x4f2   :  { %v1856_v21 = vmax.f32 %v1736_v16, %v1837_v47  ;;  %v2870_v60 = vpack.c.bf16 %v2085_v52, %v2084_v11  ;;  %v2087_v16 = vld [vmem:[%s4579_s13 + $0x48] sm:$0xff] }
 0x504   :  { %v2498_v26 = vpop.f32.mrb[66].mxu0  ;;  %v2536_v50 = vpop.f32.mrb[58].mxu1 }
 0x505   :  { %v1859_v6 = vmax.f32 %v2498_v26, %v2536_v50  ;;  %v1746_v30 = vpop.f32.mrb[67].mxu0  ;;  %v1847_v37 = vpop.f32.mrb[59].mxu1 }
 0x506   :  { %v1858_v25 = vmax.f32 %v1746_v30, %v1847_v37 }
 0x507   :  { %v3098_v33 = vpack.i.bf16 %v1857_v13, %v1859_v6  ;;  %v2086_v13 = vld [vmem:[%s4579_s13 + $0x40] sm:$0xff] }
 0x508   :  { %v2873_v47 = vpack.c.bf16 %v2087_v16, %v2086_v13 }
 0x509   :  { %3099 = vrot.lane.b32.xlu0 %v3098_v33, %s3113_s21 }
 0x57b   :  { %v3100_v10 = vpop.permute.xlu0 %3099 }
 0x57c   :  { %v3102_v45 = vunpack.i.h.bf16 %v3100_v10  ;;  %v3101_v28 = vunpack.i.l.bf16 %v3100_v10 }
 0x57e   :  { %v1870_v49 = vsel %vm1868_vm13, %v1858_v25, %v3101_v28  ;;  %v1869_v51 = vsel %vm1868_vm13, %v1856_v21, %v3102_v45  ;;  %v2088_v21 = vld [vmem:[%s4579_s13 + $0x50] sm:$0xf] }
 0x57f   :  { %1974 = vmatprep.mubr.f32.mxu0 %v1870_v49 }
 0x580   :  { %1975 = vmatmul.mubr.f32.vlgmr.msra.gmra.mrb[68].mxu0 %v1869_v51 }
 0x653   :  { %v2392_v31 = vpop.f32.mrb[68].mxu0 }
 0x654   :  { %v2393_v20 = vpop.f32.mrb[69].mxu0 }
 0x655   :  { %v2394_v61 = vadd.f32 %v2393_v20, %v2392_v31 }
 0x657   :  { %v1977_v32 = vadd.f32 %v2394_v61, %v2237_v8 }
 0x659   :  { %v1980_v40 = vmax.f32 %v1977_v32, 0.0 }
 0x65b   :  { %2568 = vmatmul.mubr.msk.f32.vlgmr.msra.gmra.mrb[60].mxu1 %vm2003_vm15, %v1980_v40 }
 0x65c   :  { %2862 = vmatpush3.bf16.msra.mxu1 %v2861_v24  ;;  %2592 = vmatprep.mubr.msk.f32.mxu1 %vm3115_vm14, %v3114_v58 }
 0x65d   :  { %2863 = vmatprep.subr.bf16.mxu1 %v3108_v46 }
 0x660   :  { %2865 = vmatpush3.bf16.msra.mxu1 %v2864_v0 }
 0x661   :  { %2866 = vmatprep.subr.bf16.mxu1 %v3108_v46 }
 0x664   :  { %2868 = vmatpush3.bf16.msra.mxu1 %v2867_v9 }
 0x665   :  { %2869 = vmatprep.subr.bf16.mxu1 %v3108_v46 }
 0x668   :  { %2871 = vmatpush3.bf16.msra.mxu1 %v2870_v60 }
 0x669   :  { %2872 = vmatprep.subr.bf16.mxu1 %v3108_v46  ;;  %v2238_v46 = vld [vmem:[%s4580_s12] ss:$0 sm:$0xff] }
 0x66c   :  { %2874 = vmatpush3.bf16.msra.mxu1 %v2873_v47 }
 0x66d   :  { %2590 = vmatprep.subr.mxu1 %v3114_v58 }
 0x670   :  { %2591 = vmatpush3.msk.msra.mxu1 %vm590_vm0, %v2088_v21 }
 0x72e   :  { %v2073_v23 = vpop.f32.mrb[60].mxu1 }
 0x72f   :  { %v2074_v19 = vadd.f32 %v2238_v46, %v2073_v23  ;;  %v2569_v59 = vpop.f32.mrb[61].mxu1 }
 0x731   :  { %v2077_v22 = vmax.f32 %v2074_v19, 0.0 }
 0x733   :  { %2593 = vmatmul.mubr.msk.f32.vlgmr.msra.gmra.mrb[62].mxu1 %vm443_vm6, %v2077_v22 }
 0x806   :  { %v2168_v29 = vpop.f32.mrb[62].mxu1 }
 0x807   :  { %v2169_v2 = vadd.f32 %v2240_v34, %v2168_v29  ;;  %v2594_v1 = vpop.f32.mrb[63].mxu1 }
 0x809   :  { %2173 = vst.msk [vmem:[%s4582_s15] sm:$0xff] %vm2172_vm1, %v2169_v2 }

</bundles_post_ra>
